<compile_context>
chip_gen: v6e
topology: v6e:2x2x1
jax: 0.10.0
libtpu: 0.0.40
codegen_flags: <defaults>
</compile_context>

<pallas_src>
import functools

import jax
import jax.numpy as jnp
import numpy as np
from jax.experimental import pallas as pl
from jax.experimental.pallas import tpu as pltpu


def _round_up(x, m):
    return ((x + m - 1) // m) * m


def gru_chunk_kernel(x_ref,                  # (TQ, Hp) bf16  embedded tokens for this chunk
                     h0_ref,                 # (1, Hp)  f32   initial hidden
                     wih_ref, whh_ref,       # (Hp, 3Hp) bf16, gate order [r, z, n], lane-aligned stripes
                     bih_ref, bhh_ref,       # (1, 3Hp) f32
                     wdec_ref, bdec_ref,     # (Hp, OP) bf16, (1, OP) f32
                     out_ref,                # (TQ, OP) f32   per-chunk logits
                     h_ref,                  # (1, Hp)  f32   hidden carry (VMEM-resident)
                     *, TQ, T, Hp, padded):
    c = pl.program_id(0)

    @pl.when(c == 0)
    def _():
        h_ref[...] = h0_ref[...]

    # Input-side gate pre-activations for the whole chunk: one MXU matmul
    # (full sublane occupancy) instead of TQ tiny M=1 matmuls.
    gi = jnp.dot(x_ref[...], wih_ref[...],
                 preferred_element_type=jnp.float32) + bih_ref[...]
    gi_r = gi[:, 0 * Hp:1 * Hp]          # lane-aligned whole-vreg stripes
    gi_z = gi[:, 1 * Hp:2 * Hp]
    gi_n = gi[:, 2 * Hp:3 * Hp]

    whh = whh_ref[...]
    bhh = bhh_ref[...]

    h = h_ref[...]                       # (1, Hp) f32 carry
    hs = []
    for t in range(TQ):                  # fully unrolled serial recurrence
        gh = jnp.dot(h.astype(jnp.bfloat16), whh,
                     preferred_element_type=jnp.float32) + bhh
        r = jax.nn.sigmoid(gi_r[t:t + 1] + gh[:, 0 * Hp:1 * Hp])
        z = jax.nn.sigmoid(gi_z[t:t + 1] + gh[:, 1 * Hp:2 * Hp])
        n = jnp.tanh(gi_n[t:t + 1] + r * gh[:, 2 * Hp:3 * Hp])
        h_new = (1.0 - z) * n + z * h    # PyTorch GRU cell update
        if padded:                       # keep h fixed on padded tail steps
            h_new = jnp.where(c * TQ + t < T, h_new, h)
        h = h_new
        hs.append(h)
    h_ref[...] = h

    # Decoder for the whole chunk: one (TQ,Hp)x(Hp,OP) matmul + dense store.
    h_chunk = jnp.concatenate(hs, axis=0).astype(jnp.bfloat16)
    out_ref[...] = (jnp.dot(h_chunk, wdec_ref[...],
                            preferred_element_type=jnp.float32) + bdec_ref[...])


def make_gru_call(Tp, TQ, T, Hp, OP):
    num_chunks = Tp // TQ
    kernel = functools.partial(gru_chunk_kernel, TQ=TQ, T=T, Hp=Hp,
                               padded=(Tp != T))
    grid_spec = pltpu.PrefetchScalarGridSpec(
        num_scalar_prefetch=0,
        grid=(num_chunks,),
        in_specs=[
            pl.BlockSpec((TQ, Hp),     lambda c: (c, 0)),   # x chunk (pipelined)
            pl.BlockSpec((1, Hp),      lambda c: (0, 0)),   # h0
            pl.BlockSpec((Hp, 3 * Hp), lambda c: (0, 0)),   # Wih (resident)
            pl.BlockSpec((Hp, 3 * Hp), lambda c: (0, 0)),   # Whh (resident)
            pl.BlockSpec((1, 3 * Hp),  lambda c: (0, 0)),   # bih
            pl.BlockSpec((1, 3 * Hp),  lambda c: (0, 0)),   # bhh
            pl.BlockSpec((Hp, OP),     lambda c: (0, 0)),   # Wdec (resident)
            pl.BlockSpec((1, OP),      lambda c: (0, 0)),   # bdec
        ],
        out_specs=(
            pl.BlockSpec((TQ, OP), lambda c: (c, 0)),       # per-chunk logits
            pl.BlockSpec((1, Hp),  lambda c: (0, 0)),       # hidden carry
        ),
    )
    return pl.pallas_call(
        kernel,
        out_shape=(jax.ShapeDtypeStruct((Tp, OP), jnp.float32),
                   jax.ShapeDtypeStruct((1, Hp), jnp.float32)),
        grid_spec=grid_spec,
        compiler_params=pltpu.CompilerParams(
            dimension_semantics=("arbitrary",),             # serial recurrence
            vmem_limit_bytes=32 * 1024 * 1024),
    )


# ----------------------------- parameters ---------------------------------

def init_params(key, V, H, O):
    ks = jax.random.split(key, 7)
    s = 1.0 / np.sqrt(H)
    return {
        "emb":  jax.random.normal(ks[0], (V, H), jnp.float32),
        # Fused + pre-transposed GRU weights: pre-activation is x @ W (gate order r,z,n).
        "wih":  jax.random.uniform(ks[1], (H, 3 * H), jnp.float32, -s, s),
        "whh":  jax.random.uniform(ks[2], (H, 3 * H), jnp.float32, -s, s),
        "bih":  jax.random.uniform(ks[3], (1, 3 * H), jnp.float32, -s, s),
        "bhh":  jax.random.uniform(ks[4], (1, 3 * H), jnp.float32, -s, s),
        "wdec": jax.random.uniform(ks[5], (H, O), jnp.float32, -s, s),
        "bdec": jax.random.uniform(ks[6], (1, O), jnp.float32, -s, s),
    }


def _pad_gate_cols(a, H, Hp):
    """(.., 3H) gate-concatenated [r,z,n] -> (.., 3Hp); each gate stripe starts at g*Hp."""
    parts = []
    for g in range(3):
        blk = a[..., g * H:(g + 1) * H]
        parts.append(jnp.pad(blk, [(0, 0)] * (a.ndim - 1) + [(0, Hp - H)]))
    return jnp.concatenate(parts, axis=-1)


def _pad_gru_weight(w, H, Hp):
    """(H, 3H) -> (Hp, 3Hp), zero padding; padded lanes stay 0 through the recurrence."""
    return jnp.pad(_pad_gate_cols(w, H, Hp), ((0, Hp - H), (0, 0)))


# ------------------------------ forward ------------------------------------

def _rnn_forward_seq(params, tokens, hidden):
    """tokens: (T,) int32; hidden: (1,1,H) -> (logits (T,O), hidden (1,1,H))."""
    V, H = params["emb"].shape
    O = params["wdec"].shape[-1]
    Hp = _round_up(H, 128)               # lane-aligned gate stripes
    OP = _round_up(O, 128)               # lane-dense decoder output
    T = int(tokens.shape[0])
    TQ = 8                               # time-chunk size (sublane-dense blocks)
    Tp = _round_up(max(T, TQ), TQ)

    # Embedding lookup (XLA gather) + lane padding; all matmuls run in-kernel.
    x = jnp.take(params["emb"], tokens.astype(jnp.int32), axis=0)       # (T, H)
    x = jnp.pad(x, ((0, Tp - T), (0, Hp - H))).astype(jnp.bfloat16)

    wih = _pad_gru_weight(params["wih"], H, Hp).astype(jnp.bfloat16)
    whh = _pad_gru_weight(params["whh"], H, Hp).astype(jnp.bfloat16)
    bih = _pad_gate_cols(params["bih"], H, Hp)
    bhh = _pad_gate_cols(params["bhh"], H, Hp)
    wdec = jnp.pad(params["wdec"], ((0, Hp - H), (0, OP - O))).astype(jnp.bfloat16)
    bdec = jnp.pad(params["bdec"], ((0, 0), (0, OP - O)))
    h0 = jnp.pad(hidden.reshape(1, H), ((0, 0), (0, Hp - H)))

    logits_p, h_p = make_gru_call(Tp, TQ, T, Hp, OP)(
        x, h0, wih, whh, bih, bhh, wdec, bdec)
    return logits_p[:T, :O], h_p[:, :H].reshape(1, 1, H)


rnn_forward_seq = jax.jit(_rnn_forward_seq)


def rnn_forward(params, token, hidden):
    """Matches the PyTorch module's forward(input, hidden) for a single token."""
    out, h_new = rnn_forward_seq(params, jnp.reshape(token, (1,)), hidden)
    return out, h_new


# ------------------------------ reference ----------------------------------

def rnn_forward_seq_ref(params, tokens, hidden, matmul_dtype=jnp.float32):
    """Pure-JAX PyTorch-GRU-semantics reference (matmul operands in matmul_dtype)."""
    H = params["emb"].shape[1]
    cast = lambda a: a.astype(matmul_dtype)
    h = hidden.reshape(1, H).astype(jnp.float32)
    outs = []
    for t in range(int(tokens.shape[0])):
        x = params["emb"][tokens[t]][None, :]
        gi = jnp.dot(cast(x), cast(params["wih"]),
                     preferred_element_type=jnp.float32) + params["bih"]
        gh = jnp.dot(cast(h), cast(params["whh"]),
                     preferred_element_type=jnp.float32) + params["bhh"]
        r = jax.nn.sigmoid(gi[:, 0:H] + gh[:, 0:H])
        z = jax.nn.sigmoid(gi[:, H:2 * H] + gh[:, H:2 * H])
        n = jnp.tanh(gi[:, 2 * H:] + r * gh[:, 2 * H:])
        h = (1.0 - z) * n + z * h
        outs.append(jnp.dot(cast(h), cast(params["wdec"]),
                            preferred_element_type=jnp.float32) + params["bdec"])
    return jnp.concatenate(outs, axis=0), h.reshape(1, 1, H)


if __name__ == "__main__":
    V, H, O, T = 64, 32, 16, 8    # vocab(input_size), hidden_size, output_size, seq len
    key = jax.random.PRNGKey(0)
    kp, kt = jax.random.split(key, 2)

    params = init_params(kp, V, H, O)
    tokens = jax.random.randint(kt, (T,), 0, V, dtype=jnp.int32)
    hidden = jnp.zeros((1, 1, H), jnp.float32)   # init_hidden()

    # Whole sequence: T GRU steps fused into one pallas_call.
    out_seq, h_seq = jax.block_until_ready(rnn_forward_seq(params, tokens, hidden))

    # Precision-matched reference (bf16 matmul operands, f32 accum/elementwise).
    out_bf, h_bf = rnn_forward_seq_ref(params, tokens, hidden, jnp.bfloat16)
    np.testing.assert_allclose(np.asarray(out_seq), np.asarray(out_bf), atol=5e-3, rtol=5e-3)
    np.testing.assert_allclose(np.asarray(h_seq), np.asarray(h_bf), atol=5e-3, rtol=5e-3)

    # Full-f32 PyTorch-semantics reference (loose tolerance due to bf16 weights).
    out_f32, h_f32 = rnn_forward_seq_ref(params, tokens, hidden, jnp.float32)
    np.testing.assert_allclose(np.asarray(out_seq), np.asarray(out_f32), atol=5e-2, rtol=5e-2)
    np.testing.assert_allclose(np.asarray(h_seq), np.asarray(h_f32), atol=5e-2, rtol=5e-2)

    # Single step == the PyTorch module's forward(input, hidden)
    # (also exercises the padded-tail masking path: T=1 -> Tp=8).
    out1, h1 = jax.block_until_ready(rnn_forward(params, tokens[:1], hidden))
    out1_bf, h1_bf = rnn_forward_seq_ref(params, tokens[:1], hidden, jnp.bfloat16)
    np.testing.assert_allclose(np.asarray(out1), np.asarray(out1_bf), atol=5e-3, rtol=5e-3)
    np.testing.assert_allclose(np.asarray(h1), np.asarray(h1_bf), atol=5e-3, rtol=5e-3)

    print("KERNEL_OK")
</pallas_src>

<mosaic_0001>
module attributes {stable_mosaic.version = 11 : i64} {
  func.func @gru_chunk_kernel(%arg0: i32, %arg1: memref<8x128xbf16, #tpu.memory_space<vmem>>, %arg2: memref<1x128xf32, #tpu.memory_space<vmem>>, %arg3: memref<128x384xbf16, #tpu.memory_space<vmem>>, %arg4: memref<128x384xbf16, #tpu.memory_space<vmem>>, %arg5: memref<1x384xf32, #tpu.memory_space<vmem>>, %arg6: memref<1x384xf32, #tpu.memory_space<vmem>>, %arg7: memref<128x128xbf16, #tpu.memory_space<vmem>>, %arg8: memref<1x128xf32, #tpu.memory_space<vmem>>, %arg9: memref<8x128xf32, #tpu.memory_space<vmem>>, %arg10: memref<1x128xf32, #tpu.memory_space<vmem>>) attributes {dimension_semantics = [#tpu.dimension_semantics<arbitrary>], iteration_bounds = array<i64: 1>, scalar_prefetch = 0 : i64, scratch_operands = 0 : i64, tpu.core_type = #tpu.core_type<tc>, window_params = [{transform_indices = @transform_0, window_bounds = array<i64: 8, 128>}, {pipeline_mode = #tpu.pipeline_mode<synchronous>, transform_indices = @transform_1, window_bounds = array<i64: 1, 128>}, {pipeline_mode = #tpu.pipeline_mode<synchronous>, transform_indices = @transform_2, window_bounds = array<i64: 128, 384>}, {pipeline_mode = #tpu.pipeline_mode<synchronous>, transform_indices = @transform_3, window_bounds = array<i64: 128, 384>}, {pipeline_mode = #tpu.pipeline_mode<synchronous>, transform_indices = @transform_4, window_bounds = array<i64: 1, 384>}, {pipeline_mode = #tpu.pipeline_mode<synchronous>, transform_indices = @transform_5, window_bounds = array<i64: 1, 384>}, {pipeline_mode = #tpu.pipeline_mode<synchronous>, transform_indices = @transform_6, window_bounds = array<i64: 128, 128>}, {pipeline_mode = #tpu.pipeline_mode<synchronous>, transform_indices = @transform_7, window_bounds = array<i64: 1, 128>}, {transform_indices = @transform_8, window_bounds = array<i64: 8, 128>}, {pipeline_mode = #tpu.pipeline_mode<synchronous>, transform_indices = @transform_9, window_bounds = array<i64: 1, 128>}]} {
    %c0_i32 = arith.constant 0 : i32
    %0 = arith.cmpi eq, %arg0, %c0_i32 : i32
    %1 = arith.extui %0 : i1 to i32
    %c0_i32_0 = arith.constant 0 : i32
    %2 = arith.cmpi ne, %1, %c0_i32_0 : i32
    scf.if %2 {
      %c0_53 = arith.constant 0 : index
      %c0_54 = arith.constant 0 : index
      %256 = vector.load %arg2[%c0_53, %c0_54] : memref<1x128xf32, #tpu.memory_space<vmem>>, vector<1x128xf32>
      %c0_55 = arith.constant 0 : index
      %c0_56 = arith.constant 0 : index
      %257 = vector.load %arg10[%c0_55, %c0_56] : memref<1x128xf32, #tpu.memory_space<vmem>>, vector<1x128xf32>
      tpu.vector_store %arg10[%c0_55, %c0_56], %256 {strides = array<i32>} : memref<1x128xf32, #tpu.memory_space<vmem>>, vector<1x128xf32>,
    } else {
    }
    %c0 = arith.constant 0 : index
    %c0_1 = arith.constant 0 : index
    %3 = vector.load %arg1[%c0, %c0_1] : memref<8x128xbf16, #tpu.memory_space<vmem>>, vector<8x128xbf16>
    %c0_2 = arith.constant 0 : index
    %c0_3 = arith.constant 0 : index
    %4 = vector.load %arg3[%c0_2, %c0_3] : memref<128x384xbf16, #tpu.memory_space<vmem>>, vector<128x384xbf16>
    %cst = arith.constant dense<0.000000e+00> : vector<8x384xf32>
    %5 = tpu.matmul %3, %4, %cst {dimension_numbers = #tpu.dot_dimension_numbers<[1], [0], [0], [1], [0, 0, 1, 1], [], []>} : vector<8x128xbf16>, vector<128x384xbf16>, vector<8x384xf32> -> vector<8x384xf32>
    %c0_4 = arith.constant 0 : index
    %c0_5 = arith.constant 0 : index
    %6 = vector.load %arg5[%c0_4, %c0_5] : memref<1x384xf32, #tpu.memory_space<vmem>>, vector<1x384xf32>
    %7 = vector.broadcast %6 : vector<1x384xf32> to vector<8x384xf32>
    %8 = arith.addf %5, %7 : vector<8x384xf32>
    %9 = vector.extract_strided_slice %8 {offsets = [0, 0], sizes = [8, 128], strides = [1, 1]} : vector<8x384xf32> to vector<8x128xf32>
    %10 = vector.extract_strided_slice %8 {offsets = [0, 128], sizes = [8, 128], strides = [1, 1]} : vector<8x384xf32> to vector<8x128xf32>
    %11 = vector.extract_strided_slice %8 {offsets = [0, 256], sizes = [8, 128], strides = [1, 1]} : vector<8x384xf32> to vector<8x128xf32>
    %c0_6 = arith.constant 0 : index
    %c0_7 = arith.constant 0 : index
    %12 = vector.load %arg4[%c0_6, %c0_7] : memref<128x384xbf16, #tpu.memory_space<vmem>>, vector<128x384xbf16>
    %c0_8 = arith.constant 0 : index
    %c0_9 = arith.constant 0 : index
    %13 = vector.load %arg6[%c0_8, %c0_9] : memref<1x384xf32, #tpu.memory_space<vmem>>, vector<1x384xf32>
    %c0_10 = arith.constant 0 : index
    %c0_11 = arith.constant 0 : index
    %14 = vector.load %arg10[%c0_10, %c0_11] : memref<1x128xf32, #tpu.memory_space<vmem>>, vector<1x128xf32>
    %15 = arith.truncf %14 : vector<1x128xf32> to vector<1x128xbf16>
    %cst_12 = arith.constant dense<0.000000e+00> : vector<1x384xf32>
    %16 = tpu.matmul %15, %12, %cst_12 {dimension_numbers = #tpu.dot_dimension_numbers<[1], [0], [0], [1], [0, 0, 1, 1], [], []>} : vector<1x128xbf16>, vector<128x384xbf16>, vector<1x384xf32> -> vector<1x384xf32>
    %17 = arith.addf %16, %13 : vector<1x384xf32>
    %18 = vector.extract_strided_slice %9 {offsets = [0, 0], sizes = [1, 128], strides = [1, 1]} : vector<8x128xf32> to vector<1x128xf32>
    %19 = vector.extract_strided_slice %17 {offsets = [0, 0], sizes = [1, 128], strides = [1, 1]} : vector<1x384xf32> to vector<1x128xf32>
    %20 = arith.addf %18, %19 : vector<1x128xf32>
    %21 = arith.negf %20 : vector<1x128xf32>
    %22 = math.exp %21 : vector<1x128xf32>
    %cst_13 = arith.constant 1.000000e+00 : f32
    %23 = vector.broadcast %cst_13 : f32 to vector<1x128xf32>
    %24 = arith.addf %23, %22 : vector<1x128xf32>
    %25 = arith.divf %23, %24 : vector<1x128xf32>
    %26 = vector.extract_strided_slice %10 {offsets = [0, 0], sizes = [1, 128], strides = [1, 1]} : vector<8x128xf32> to vector<1x128xf32>
    %27 = vector.extract_strided_slice %17 {offsets = [0, 128], sizes = [1, 128], strides = [1, 1]} : vector<1x384xf32> to vector<1x128xf32>
    %28 = arith.addf %26, %27 : vector<1x128xf32>
    %29 = arith.negf %28 : vector<1x128xf32>
    %30 = math.exp %29 : vector<1x128xf32>
    %cst_14 = arith.constant 1.000000e+00 : f32
    %31 = vector.broadcast %cst_14 : f32 to vector<1x128xf32>
    %32 = arith.addf %31, %30 : vector<1x128xf32>
    %33 = arith.divf %31, %32 : vector<1x128xf32>
    %34 = vector.extract_strided_slice %11 {offsets = [0, 0], sizes = [1, 128], strides = [1, 1]} : vector<8x128xf32> to vector<1x128xf32>
    %35 = vector.extract_strided_slice %17 {offsets = [0, 256], sizes = [1, 128], strides = [1, 1]} : vector<1x384xf32> to vector<1x128xf32>
    %36 = arith.mulf %25, %35 : vector<1x128xf32>
    %37 = arith.addf %34, %36 : vector<1x128xf32>
    %38 = math.tanh %37 : vector<1x128xf32>
    %cst_15 = arith.constant 1.000000e+00 : f32
    %39 = vector.broadcast %cst_15 : f32 to vector<1x128xf32>
    %40 = arith.subf %39, %33 : vector<1x128xf32>
    %41 = arith.mulf %40, %38 : vector<1x128xf32>
    %42 = arith.mulf %33, %14 : vector<1x128xf32>
    %43 = arith.addf %41, %42 : vector<1x128xf32>
    %44 = arith.truncf %43 : vector<1x128xf32> to vector<1x128xbf16>
    %cst_16 = arith.constant dense<0.000000e+00> : vector<1x384xf32>
    %45 = tpu.matmul %44, %12, %cst_16 {dimension_numbers = #tpu.dot_dimension_numbers<[1], [0], [0], [1], [0, 0, 1, 1], [], []>} : vector<1x128xbf16>, vector<128x384xbf16>, vector<1x384xf32> -> vector<1x384xf32>
    %46 = arith.addf %45, %13 : vector<1x384xf32>
    %47 = vector.extract_strided_slice %9 {offsets = [1, 0], sizes = [1, 128], strides = [1, 1]} : vector<8x128xf32> to vector<1x128xf32>
    %48 = vector.extract_strided_slice %46 {offsets = [0, 0], sizes = [1, 128], strides = [1, 1]} : vector<1x384xf32> to vector<1x128xf32>
    %49 = arith.addf %47, %48 : vector<1x128xf32>
    %50 = arith.negf %49 : vector<1x128xf32>
    %51 = math.exp %50 : vector<1x128xf32>
    %cst_17 = arith.constant 1.000000e+00 : f32
    %52 = vector.broadcast %cst_17 : f32 to vector<1x128xf32>
    %53 = arith.addf %52, %51 : vector<1x128xf32>
    %54 = arith.divf %52, %53 : vector<1x128xf32>
    %55 = vector.extract_strided_slice %10 {offsets = [1, 0], sizes = [1, 128], strides = [1, 1]} : vector<8x128xf32> to vector<1x128xf32>
    %56 = vector.extract_strided_slice %46 {offsets = [0, 128], sizes = [1, 128], strides = [1, 1]} : vector<1x384xf32> to vector<1x128xf32>
    %57 = arith.addf %55, %56 : vector<1x128xf32>
    %58 = arith.negf %57 : vector<1x128xf32>
    %59 = math.exp %58 : vector<1x128xf32>
    %cst_18 = arith.constant 1.000000e+00 : f32
    %60 = vector.broadcast %cst_18 : f32 to vector<1x128xf32>
    %61 = arith.addf %60, %59 : vector<1x128xf32>
    %62 = arith.divf %60, %61 : vector<1x128xf32>
    %63 = vector.extract_strided_slice %11 {offsets = [1, 0], sizes = [1, 128], strides = [1, 1]} : vector<8x128xf32> to vector<1x128xf32>
    %64 = vector.extract_strided_slice %46 {offsets = [0, 256], sizes = [1, 128], strides = [1, 1]} : vector<1x384xf32> to vector<1x128xf32>
    %65 = arith.mulf %54, %64 : vector<1x128xf32>
    %66 = arith.addf %63, %65 : vector<1x128xf32>
    %67 = math.tanh %66 : vector<1x128xf32>
    %cst_19 = arith.constant 1.000000e+00 : f32
    %68 = vector.broadcast %cst_19 : f32 to vector<1x128xf32>
    %69 = arith.subf %68, %62 : vector<1x128xf32>
    %70 = arith.mulf %69, %67 : vector<1x128xf32>
    %71 = arith.mulf %62, %43 : vector<1x128xf32>
    %72 = arith.addf %70, %71 : vector<1x128xf32>
    %73 = arith.truncf %72 : vector<1x128xf32> to vector<1x128xbf16>
    %cst_20 = arith.constant dense<0.000000e+00> : vector<1x384xf32>
    %74 = tpu.matmul %73, %12, %cst_20 {dimension_numbers = #tpu.dot_dimension_numbers<[1], [0], [0], [1], [0, 0, 1, 1], [], []>} : vector<1x128xbf16>, vector<128x384xbf16>, vector<1x384xf32> -> vector<1x384xf32>
    %75 = arith.addf %74, %13 : vector<1x384xf32>
    %76 = vector.extract_strided_slice %9 {offsets = [2, 0], sizes = [1, 128], strides = [1, 1]} : vector<8x128xf32> to vector<1x128xf32>
    %77 = vector.extract_strided_slice %75 {offsets = [0, 0], sizes = [1, 128], strides = [1, 1]} : vector<1x384xf32> to vector<1x128xf32>
    %78 = arith.addf %76, %77 : vector<1x128xf32>
    %79 = arith.negf %78 : vector<1x128xf32>
    %80 = math.exp %79 : vector<1x128xf32>
    %cst_21 = arith.constant 1.000000e+00 : f32
    %81 = vector.broadcast %cst_21 : f32 to vector<1x128xf32>
    %82 = arith.addf %81, %80 : vector<1x128xf32>
    %83 = arith.divf %81, %82 : vector<1x128xf32>
    %84 = vector.extract_strided_slice %10 {offsets = [2, 0], sizes = [1, 128], strides = [1, 1]} : vector<8x128xf32> to vector<1x128xf32>
    %85 = vector.extract_strided_slice %75 {offsets = [0, 128], sizes = [1, 128], strides = [1, 1]} : vector<1x384xf32> to vector<1x128xf32>
    %86 = arith.addf %84, %85 : vector<1x128xf32>
    %87 = arith.negf %86 : vector<1x128xf32>
    %88 = math.exp %87 : vector<1x128xf32>
    %cst_22 = arith.constant 1.000000e+00 : f32
    %89 = vector.broadcast %cst_22 : f32 to vector<1x128xf32>
    %90 = arith.addf %89, %88 : vector<1x128xf32>
    %91 = arith.divf %89, %90 : vector<1x128xf32>
    %92 = vector.extract_strided_slice %11 {offsets = [2, 0], sizes = [1, 128], strides = [1, 1]} : vector<8x128xf32> to vector<1x128xf32>
    %93 = vector.extract_strided_slice %75 {offsets = [0, 256], sizes = [1, 128], strides = [1, 1]} : vector<1x384xf32> to vector<1x128xf32>
    %94 = arith.mulf %83, %93 : vector<1x128xf32>
    %95 = arith.addf %92, %94 : vector<1x128xf32>
    %96 = math.tanh %95 : vector<1x128xf32>
    %cst_23 = arith.constant 1.000000e+00 : f32
    %97 = vector.broadcast %cst_23 : f32 to vector<1x128xf32>
    %98 = arith.subf %97, %91 : vector<1x128xf32>
    %99 = arith.mulf %98, %96 : vector<1x128xf32>
    %100 = arith.mulf %91, %72 : vector<1x128xf32>
    %101 = arith.addf %99, %100 : vector<1x128xf32>
    %102 = arith.truncf %101 : vector<1x128xf32> to vector<1x128xbf16>
    %cst_24 = arith.constant dense<0.000000e+00> : vector<1x384xf32>
    %103 = tpu.matmul %102, %12, %cst_24 {dimension_numbers = #tpu.dot_dimension_numbers<[1], [0], [0], [1], [0, 0, 1, 1], [], []>} : vector<1x128xbf16>, vector<128x384xbf16>, vector<1x384xf32> -> vector<1x384xf32>
    %104 = arith.addf %103, %13 : vector<1x384xf32>
    %105 = vector.extract_strided_slice %9 {offsets = [3, 0], sizes = [1, 128], strides = [1, 1]} : vector<8x128xf32> to vector<1x128xf32>
    %106 = vector.extract_strided_slice %104 {offsets = [0, 0], sizes = [1, 128], strides = [1, 1]} : vector<1x384xf32> to vector<1x128xf32>
    %107 = arith.addf %105, %106 : vector<1x128xf32>
    %108 = arith.negf %107 : vector<1x128xf32>
    %109 = math.exp %108 : vector<1x128xf32>
    %cst_25 = arith.constant 1.000000e+00 : f32
    %110 = vector.broadcast %cst_25 : f32 to vector<1x128xf32>
    %111 = arith.addf %110, %109 : vector<1x128xf32>
    %112 = arith.divf %110, %111 : vector<1x128xf32>
    %113 = vector.extract_strided_slice %10 {offsets = [3, 0], sizes = [1, 128], strides = [1, 1]} : vector<8x128xf32> to vector<1x128xf32>
    %114 = vector.extract_strided_slice %104 {offsets = [0, 128], sizes = [1, 128], strides = [1, 1]} : vector<1x384xf32> to vector<1x128xf32>
    %115 = arith.addf %113, %114 : vector<1x128xf32>
    %116 = arith.negf %115 : vector<1x128xf32>
    %117 = math.exp %116 : vector<1x128xf32>
    %cst_26 = arith.constant 1.000000e+00 : f32
    %118 = vector.broadcast %cst_26 : f32 to vector<1x128xf32>
    %119 = arith.addf %118, %117 : vector<1x128xf32>
    %120 = arith.divf %118, %119 : vector<1x128xf32>
    %121 = vector.extract_strided_slice %11 {offsets = [3, 0], sizes = [1, 128], strides = [1, 1]} : vector<8x128xf32> to vector<1x128xf32>
    %122 = vector.extract_strided_slice %104 {offsets = [0, 256], sizes = [1, 128], strides = [1, 1]} : vector<1x384xf32> to vector<1x128xf32>
    %123 = arith.mulf %112, %122 : vector<1x128xf32>
    %124 = arith.addf %121, %123 : vector<1x128xf32>
    %125 = math.tanh %124 : vector<1x128xf32>
    %cst_27 = arith.constant 1.000000e+00 : f32
    %126 = vector.broadcast %cst_27 : f32 to vector<1x128xf32>
    %127 = arith.subf %126, %120 : vector<1x128xf32>
    %128 = arith.mulf %127, %125 : vector<1x128xf32>
    %129 = arith.mulf %120, %101 : vector<1x128xf32>
    %130 = arith.addf %128, %129 : vector<1x128xf32>
    %131 = arith.truncf %130 : vector<1x128xf32> to vector<1x128xbf16>
    %cst_28 = arith.constant dense<0.000000e+00> : vector<1x384xf32>
    %132 = tpu.matmul %131, %12, %cst_28 {dimension_numbers = #tpu.dot_dimension_numbers<[1], [0], [0], [1], [0, 0, 1, 1], [], []>} : vector<1x128xbf16>, vector<128x384xbf16>, vector<1x384xf32> -> vector<1x384xf32>
    %133 = arith.addf %132, %13 : vector<1x384xf32>
    %134 = vector.extract_strided_slice %9 {offsets = [4, 0], sizes = [1, 128], strides = [1, 1]} : vector<8x128xf32> to vector<1x128xf32>
    %135 = vector.extract_strided_slice %133 {offsets = [0, 0], sizes = [1, 128], strides = [1, 1]} : vector<1x384xf32> to vector<1x128xf32>
    %136 = arith.addf %134, %135 : vector<1x128xf32>
    %137 = arith.negf %136 : vector<1x128xf32>
    %138 = math.exp %137 : vector<1x128xf32>
    %cst_29 = arith.constant 1.000000e+00 : f32
    %139 = vector.broadcast %cst_29 : f32 to vector<1x128xf32>
    %140 = arith.addf %139, %138 : vector<1x128xf32>
    %141 = arith.divf %139, %140 : vector<1x128xf32>
    %142 = vector.extract_strided_slice %10 {offsets = [4, 0], sizes = [1, 128], strides = [1, 1]} : vector<8x128xf32> to vector<1x128xf32>
    %143 = vector.extract_strided_slice %133 {offsets = [0, 128], sizes = [1, 128], strides = [1, 1]} : vector<1x384xf32> to vector<1x128xf32>
    %144 = arith.addf %142, %143 : vector<1x128xf32>
    %145 = arith.negf %144 : vector<1x128xf32>
    %146 = math.exp %145 : vector<1x128xf32>
    %cst_30 = arith.constant 1.000000e+00 : f32
    %147 = vector.broadcast %cst_30 : f32 to vector<1x128xf32>
    %148 = arith.addf %147, %146 : vector<1x128xf32>
    %149 = arith.divf %147, %148 : vector<1x128xf32>
    %150 = vector.extract_strided_slice %11 {offsets = [4, 0], sizes = [1, 128], strides = [1, 1]} : vector<8x128xf32> to vector<1x128xf32>
    %151 = vector.extract_strided_slice %133 {offsets = [0, 256], sizes = [1, 128], strides = [1, 1]} : vector<1x384xf32> to vector<1x128xf32>
    %152 = arith.mulf %141, %151 : vector<1x128xf32>
    %153 = arith.addf %150, %152 : vector<1x128xf32>
    %154 = math.tanh %153 : vector<1x128xf32>
    %cst_31 = arith.constant 1.000000e+00 : f32
    %155 = vector.broadcast %cst_31 : f32 to vector<1x128xf32>
    %156 = arith.subf %155, %149 : vector<1x128xf32>
    %157 = arith.mulf %156, %154 : vector<1x128xf32>
    %158 = arith.mulf %149, %130 : vector<1x128xf32>
    %159 = arith.addf %157, %158 : vector<1x128xf32>
    %160 = arith.truncf %159 : vector<1x128xf32> to vector<1x128xbf16>
    %cst_32 = arith.constant dense<0.000000e+00> : vector<1x384xf32>
    %161 = tpu.matmul %160, %12, %cst_32 {dimension_numbers = #tpu.dot_dimension_numbers<[1], [0], [0], [1], [0, 0, 1, 1], [], []>} : vector<1x128xbf16>, vector<128x384xbf16>, vector<1x384xf32> -> vector<1x384xf32>
    %162 = arith.addf %161, %13 : vector<1x384xf32>
    %163 = vector.extract_strided_slice %9 {offsets = [5, 0], sizes = [1, 128], strides = [1, 1]} : vector<8x128xf32> to vector<1x128xf32>
    %164 = vector.extract_strided_slice %162 {offsets = [0, 0], sizes = [1, 128], strides = [1, 1]} : vector<1x384xf32> to vector<1x128xf32>
    %165 = arith.addf %163, %164 : vector<1x128xf32>
    %166 = arith.negf %165 : vector<1x128xf32>
    %167 = math.exp %166 : vector<1x128xf32>
    %cst_33 = arith.constant 1.000000e+00 : f32
    %168 = vector.broadcast %cst_33 : f32 to vector<1x128xf32>
    %169 = arith.addf %168, %167 : vector<1x128xf32>
    %170 = arith.divf %168, %169 : vector<1x128xf32>
    %171 = vector.extract_strided_slice %10 {offsets = [5, 0], sizes = [1, 128], strides = [1, 1]} : vector<8x128xf32> to vector<1x128xf32>
    %172 = vector.extract_strided_slice %162 {offsets = [0, 128], sizes = [1, 128], strides = [1, 1]} : vector<1x384xf32> to vector<1x128xf32>
    %173 = arith.addf %171, %172 : vector<1x128xf32>
    %174 = arith.negf %173 : vector<1x128xf32>
    %175 = math.exp %174 : vector<1x128xf32>
    %cst_34 = arith.constant 1.000000e+00 : f32
    %176 = vector.broadcast %cst_34 : f32 to vector<1x128xf32>
    %177 = arith.addf %176, %175 : vector<1x128xf32>
    %178 = arith.divf %176, %177 : vector<1x128xf32>
    %179 = vector.extract_strided_slice %11 {offsets = [5, 0], sizes = [1, 128], strides = [1, 1]} : vector<8x128xf32> to vector<1x128xf32>
    %180 = vector.extract_strided_slice %162 {offsets = [0, 256], sizes = [1, 128], strides = [1, 1]} : vector<1x384xf32> to vector<1x128xf32>
    %181 = arith.mulf %170, %180 : vector<1x128xf32>
    %182 = arith.addf %179, %181 : vector<1x128xf32>
    %183 = math.tanh %182 : vector<1x128xf32>
    %cst_35 = arith.constant 1.000000e+00 : f32
    %184 = vector.broadcast %cst_35 : f32 to vector<1x128xf32>
    %185 = arith.subf %184, %178 : vector<1x128xf32>
    %186 = arith.mulf %185, %183 : vector<1x128xf32>
    %187 = arith.mulf %178, %159 : vector<1x128xf32>
    %188 = arith.addf %186, %187 : vector<1x128xf32>
    %189 = arith.truncf %188 : vector<1x128xf32> to vector<1x128xbf16>
    %cst_36 = arith.constant dense<0.000000e+00> : vector<1x384xf32>
    %190 = tpu.matmul %189, %12, %cst_36 {dimension_numbers = #tpu.dot_dimension_numbers<[1], [0], [0], [1], [0, 0, 1, 1], [], []>} : vector<1x128xbf16>, vector<128x384xbf16>, vector<1x384xf32> -> vector<1x384xf32>
    %191 = arith.addf %190, %13 : vector<1x384xf32>
    %192 = vector.extract_strided_slice %9 {offsets = [6, 0], sizes = [1, 128], strides = [1, 1]} : vector<8x128xf32> to vector<1x128xf32>
    %193 = vector.extract_strided_slice %191 {offsets = [0, 0], sizes = [1, 128], strides = [1, 1]} : vector<1x384xf32> to vector<1x128xf32>
    %194 = arith.addf %192, %193 : vector<1x128xf32>
    %195 = arith.negf %194 : vector<1x128xf32>
    %196 = math.exp %195 : vector<1x128xf32>
    %cst_37 = arith.constant 1.000000e+00 : f32
    %197 = vector.broadcast %cst_37 : f32 to vector<1x128xf32>
    %198 = arith.addf %197, %196 : vector<1x128xf32>
    %199 = arith.divf %197, %198 : vector<1x128xf32>
    %200 = vector.extract_strided_slice %10 {offsets = [6, 0], sizes = [1, 128], strides = [1, 1]} : vector<8x128xf32> to vector<1x128xf32>
    %201 = vector.extract_strided_slice %191 {offsets = [0, 128], sizes = [1, 128], strides = [1, 1]} : vector<1x384xf32> to vector<1x128xf32>
    %202 = arith.addf %200, %201 : vector<1x128xf32>
    %203 = arith.negf %202 : vector<1x128xf32>
    %204 = math.exp %203 : vector<1x128xf32>
    %cst_38 = arith.constant 1.000000e+00 : f32
    %205 = vector.broadcast %cst_38 : f32 to vector<1x128xf32>
    %206 = arith.addf %205, %204 : vector<1x128xf32>
    %207 = arith.divf %205, %206 : vector<1x128xf32>
    %208 = vector.extract_strided_slice %11 {offsets = [6, 0], sizes = [1, 128], strides = [1, 1]} : vector<8x128xf32> to vector<1x128xf32>
    %209 = vector.extract_strided_slice %191 {offsets = [0, 256], sizes = [1, 128], strides = [1, 1]} : vector<1x384xf32> to vector<1x128xf32>
    %210 = arith.mulf %199, %209 : vector<1x128xf32>
    %211 = arith.addf %208, %210 : vector<1x128xf32>
    %212 = math.tanh %211 : vector<1x128xf32>
    %cst_39 = arith.constant 1.000000e+00 : f32
    %213 = vector.broadcast %cst_39 : f32 to vector<1x128xf32>
    %214 = arith.subf %213, %207 : vector<1x128xf32>
    %215 = arith.mulf %214, %212 : vector<1x128xf32>
    %216 = arith.mulf %207, %188 : vector<1x128xf32>
    %217 = arith.addf %215, %216 : vector<1x128xf32>
    %218 = arith.truncf %217 : vector<1x128xf32> to vector<1x128xbf16>
    %cst_40 = arith.constant dense<0.000000e+00> : vector<1x384xf32>
    %219 = tpu.matmul %218, %12, %cst_40 {dimension_numbers = #tpu.dot_dimension_numbers<[1], [0], [0], [1], [0, 0, 1, 1], [], []>} : vector<1x128xbf16>, vector<128x384xbf16>, vector<1x384xf32> -> vector<1x384xf32>
    %220 = arith.addf %219, %13 : vector<1x384xf32>
    %221 = vector.extract_strided_slice %9 {offsets = [7, 0], sizes = [1, 128], strides = [1, 1]} : vector<8x128xf32> to vector<1x128xf32>
    %222 = vector.extract_strided_slice %220 {offsets = [0, 0], sizes = [1, 128], strides = [1, 1]} : vector<1x384xf32> to vector<1x128xf32>
    %223 = arith.addf %221, %222 : vector<1x128xf32>
    %224 = arith.negf %223 : vector<1x128xf32>
    %225 = math.exp %224 : vector<1x128xf32>
    %cst_41 = arith.constant 1.000000e+00 : f32
    %226 = vector.broadcast %cst_41 : f32 to vector<1x128xf32>
    %227 = arith.addf %226, %225 : vector<1x128xf32>
    %228 = arith.divf %226, %227 : vector<1x128xf32>
    %229 = vector.extract_strided_slice %10 {offsets = [7, 0], sizes = [1, 128], strides = [1, 1]} : vector<8x128xf32> to vector<1x128xf32>
    %230 = vector.extract_strided_slice %220 {offsets = [0, 128], sizes = [1, 128], strides = [1, 1]} : vector<1x384xf32> to vector<1x128xf32>
    %231 = arith.addf %229, %230 : vector<1x128xf32>
    %232 = arith.negf %231 : vector<1x128xf32>
    %233 = math.exp %232 : vector<1x128xf32>
    %cst_42 = arith.constant 1.000000e+00 : f32
    %234 = vector.broadcast %cst_42 : f32 to vector<1x128xf32>
    %235 = arith.addf %234, %233 : vector<1x128xf32>
    %236 = arith.divf %234, %235 : vector<1x128xf32>
    %237 = vector.extract_strided_slice %11 {offsets = [7, 0], sizes = [1, 128], strides = [1, 1]} : vector<8x128xf32> to vector<1x128xf32>
    %238 = vector.extract_strided_slice %220 {offsets = [0, 256], sizes = [1, 128], strides = [1, 1]} : vector<1x384xf32> to vector<1x128xf32>
    %239 = arith.mulf %228, %238 : vector<1x128xf32>
    %240 = arith.addf %237, %239 : vector<1x128xf32>
    %241 = math.tanh %240 : vector<1x128xf32>
    %cst_43 = arith.constant 1.000000e+00 : f32
    %242 = vector.broadcast %cst_43 : f32 to vector<1x128xf32>
    %243 = arith.subf %242, %236 : vector<1x128xf32>
    %244 = arith.mulf %243, %241 : vector<1x128xf32>
    %245 = arith.mulf %236, %217 : vector<1x128xf32>
    %246 = arith.addf %244, %245 : vector<1x128xf32>
    %c0_44 = arith.constant 0 : index
    %c0_45 = arith.constant 0 : index
    %247 = vector.load %arg10[%c0_44, %c0_45] : memref<1x128xf32, #tpu.memory_space<vmem>>, vector<1x128xf32>
    tpu.vector_store %arg10[%c0_44, %c0_45], %246 {strides = array<i32>} : memref<1x128xf32, #tpu.memory_space<vmem>>, vector<1x128xf32>,
    %248 = tpu.concatenate %43, %72, %101, %130, %159, %188, %217, %246 in 0 : vector<1x128xf32>, vector<1x128xf32>, vector<1x128xf32>, vector<1x128xf32>, vector<1x128xf32>, vector<1x128xf32>, vector<1x128xf32>, vector<1x128xf32> -> vector<8x128xf32>
    %249 = arith.truncf %248 : vector<8x128xf32> to vector<8x128xbf16>
    %c0_46 = arith.constant 0 : index
    %c0_47 = arith.constant 0 : index
    %250 = vector.load %arg7[%c0_46, %c0_47] : memref<128x128xbf16, #tpu.memory_space<vmem>>, vector<128x128xbf16>
    %cst_48 = arith.constant dense<0.000000e+00> : vector<8x128xf32>
    %251 = tpu.matmul %249, %250, %cst_48 {dimension_numbers = #tpu.dot_dimension_numbers<[1], [0], [0], [1], [0, 0, 1, 1], [], []>} : vector<8x128xbf16>, vector<128x128xbf16>, vector<8x128xf32> -> vector<8x128xf32>
    %c0_49 = arith.constant 0 : index
    %c0_50 = arith.constant 0 : index
    %252 = vector.load %arg8[%c0_49, %c0_50] : memref<1x128xf32, #tpu.memory_space<vmem>>, vector<1x128xf32>
    %253 = vector.broadcast %252 : vector<1x128xf32> to vector<8x128xf32>
    %254 = arith.addf %251, %253 : vector<8x128xf32>
    %c0_51 = arith.constant 0 : index
    %c0_52 = arith.constant 0 : index
    %255 = vector.load %arg9[%c0_51, %c0_52] : memref<8x128xf32, #tpu.memory_space<vmem>>, vector<8x128xf32>
    tpu.vector_store %arg9[%c0_51, %c0_52], %254 {strides = array<i32>} : memref<8x128xf32, #tpu.memory_space<vmem>>, vector<8x128xf32>,
    return
  }
  func.func @transform_0(%arg0: i32) -> (i32, i32) {
    %c0_i32 = arith.constant 0 : i32
    %c0_i32_0 = arith.constant 0 : i32
    return %arg0, %c0_i32 : i32, i32
  }
  func.func @transform_1(%arg0: i32) -> (i32, i32) {
    %c0_i32 = arith.constant 0 : i32
    %c0_i32_0 = arith.constant 0 : i32
    %c0_i32_1 = arith.constant 0 : i32
    return %c0_i32, %c0_i32_0 : i32, i32
  }
  func.func @transform_2(%arg0: i32) -> (i32, i32) {
    %c0_i32 = arith.constant 0 : i32
    %c0_i32_0 = arith.constant 0 : i32
    %c0_i32_1 = arith.constant 0 : i32
    return %c0_i32, %c0_i32_0 : i32, i32
  }
  func.func @transform_3(%arg0: i32) -> (i32, i32) {
    %c0_i32 = arith.constant 0 : i32
    %c0_i32_0 = arith.constant 0 : i32
    %c0_i32_1 = arith.constant 0 : i32
    return %c0_i32, %c0_i32_0 : i32, i32
  }
  func.func @transform_4(%arg0: i32) -> (i32, i32) {
    %c0_i32 = arith.constant 0 : i32
    %c0_i32_0 = arith.constant 0 : i32
    %c0_i32_1 = arith.constant 0 : i32
    return %c0_i32, %c0_i32_0 : i32, i32
  }
  func.func @transform_5(%arg0: i32) -> (i32, i32) {
    %c0_i32 = arith.constant 0 : i32
    %c0_i32_0 = arith.constant 0 : i32
    %c0_i32_1 = arith.constant 0 : i32
    return %c0_i32, %c0_i32_0 : i32, i32
  }
  func.func @transform_6(%arg0: i32) -> (i32, i32) {
    %c0_i32 = arith.constant 0 : i32
    %c0_i32_0 = arith.constant 0 : i32
    %c0_i32_1 = arith.constant 0 : i32
    return %c0_i32, %c0_i32_0 : i32, i32
  }
  func.func @transform_7(%arg0: i32) -> (i32, i32) {
    %c0_i32 = arith.constant 0 : i32
    %c0_i32_0 = arith.constant 0 : i32
    %c0_i32_1 = arith.constant 0 : i32
    return %c0_i32, %c0_i32_0 : i32, i32
  }
  func.func @transform_8(%arg0: i32) -> (i32, i32) {
    %c0_i32 = arith.constant 0 : i32
    %c0_i32_0 = arith.constant 0 : i32
    return %arg0, %c0_i32 : i32, i32
  }
  func.func @transform_9(%arg0: i32) -> (i32, i32) {
    %c0_i32 = arith.constant 0 : i32
    %c0_i32_0 = arith.constant 0 : i32
    %c0_i32_1 = arith.constant 0 : i32
    return %c0_i32, %c0_i32_0 : i32, i32
  }
}

</mosaic_0001>

<bundles_post_ra>
// kernel: _rnn_forward_seq.1
= control target key start
LH: loop header
LB: loop body
LE: loop exit
PB: predicated region body
PF: predicated region fallthrough
CT: control target
= control target key end

     0   :  { %v2118_v2 = vmov 0.0   ;;  %v2119_v3 = vmov 0   ;;  %vm2120_vm0 = vmmov 0   ;;  %s2886_s0 = inlined_call_operand.vmem [shape: bf16[8,128], index: 0, kind: input, shape index: {}]   ;;  %s2887_s1 = inlined_call_operand.vmem [shape: f32[1,128], index: 1, kind: input, shape index: {}]   ;;  %s2888_s2 = inlined_call_operand.vmem [shape: bf16[128,384], index: 2, kind: input, shape index: {}]   ;;  %s2889_s3 = inlined_call_operand.vmem [shape: bf16[128,384], index: 3, kind: input, shape index: {}]   ;;  %s2890_s4 = inlined_call_operand.vmem [shape: f32[1,384], index: 4, kind: input, shape index: {}]   ;;  %s2891_s5 = inlined_call_operand.vmem [shape: f32[1,384], index: 5, kind: input, shape index: {}]   ;;  %s2892_s6 = inlined_call_operand.vmem [shape: bf16[128,128], index: 6, kind: input, shape index: {}]   ;;  %s2893_s7 = inlined_call_operand.vmem [shape: f32[1,128], index: 7, kind: input, shape index: {}]   ;;  %s2894_s8 = inlined_call_operand.hbm [shape: f32[8,128], index: 8, kind: output, shape index: {0}]   ;;  %s2895_s9 = inlined_call_operand.vmem [shape: f32[1,128], index: 9, kind: output, shape index: {1}]  }
   0x1   :  { %v1920_v0 = vld [vmem:[%s2888_s2 + $0xac] ss:$12 sps:$4 sm:$0xff]   ;;  %v1922_v1 = vld [vmem:[%s2888_s2 + $0xa8] ss:$12 sps:$4 sm:$0xff]   ;;  %1716 = vmatprep.subr.bf16.mxu1 %v2118_v2  ;;  %249 = vmatprep.mubr.bf16.mxu0 %v2119_v3  ;;  %v1925_v5 = vld [vmem:[%s2888_s2 + $0x90] ss:$12 sps:$4 sm:$0xff]  }
   0x2   :  { %217 = vmatprep.subr.bf16.mxu0 %v1920_v0  ;;  %v1923_v4 = vld [vmem:[%s2888_s2 + $0x94] ss:$12 sps:$4 sm:$0xff]   ;;  %1732 = vmatprep.mubr.msk.bf16.mxu1 %vm2120_vm0, %v2118_v2  ;;  %v1926_v6 = vld [vmem:[%s2888_s2 + $0x7c] ss:$12 sps:$4 sm:$0xff]   ;;  %v1928_v7 = vld [vmem:[%s2888_s2 + $0x78] ss:$12 sps:$4 sm:$0xff]  }
   0x3   :  { %218 = vmatpush1.bf16.msra.mxu0 %v1922_v1  ;;  %v1929_v8 = vld [vmem:[%s2888_s2 + $0x64] ss:$12 sps:$4 sm:$0xff]   ;;  %v1931_v9 = vld [vmem:[%s2888_s2 + $0x60] ss:$12 sps:$4 sm:$0xff]   ;;  %v1934_v13 = vld [vmem:[%s2888_s2 + $0x48] ss:$12 sps:$4 sm:$0xff]  }
   0x4   :  { %219 = vmatprep.subr.bf16.mxu0 %v1923_v4  ;;  %v1944_v10 = vld [vmem:[%s2888_s2 + $0xb0] ss:$12 sps:$4 sm:$0xff]   ;;  %v1932_v11 = vld [vmem:[%s2888_s2 + $0x4c] ss:$12 sps:$4 sm:$0xff]   ;;  %v1935_v14 = vld [vmem:[%s2888_s2 + $0x34] ss:$12 sps:$4 sm:$0xff]  }
   0x5   :  { %1717 = vmatpush3.bf16.msra.mxu1 %v1944_v10  ;;  %v1947_v12 = vld [vmem:[%s2888_s2 + $0x98] ss:$12 sps:$4 sm:$0xff]   ;;  %v1951_v15 = vld [vmem:[%s2888_s2 + $0x80] ss:$12 sps:$4 sm:$0xff]   ;;  %v1937_v16 = vld [vmem:[%s2888_s2 + $0x30] ss:$12 sps:$4 sm:$0xff]  }
   0x6   :  { %1718 = vmatprep.subr.bf16.mxu1 %v2118_v2  ;;  %v1938_v17 = vld [vmem:[%s2888_s2 + $0x1c] ss:$12 sps:$4 sm:$0xff]   ;;  %v1940_v19 = vld [vmem:[%s2888_s2 + $0x18] ss:$12 sps:$4 sm:$0xff]   ;;  %v1943_v22 = vld [vmem:[%s2888_s2] ss:$12 sps:$4 sm:$0xff]  }
   0x7   :  { %220 = vmatpush1.bf16.msra.mxu0 %v1925_v5  ;;  %v1955_v18 = vld [vmem:[%s2888_s2 + $0x68] ss:$12 sps:$4 sm:$0xff]   ;;  %v1941_v20 = vld [vmem:[%s2888_s2 + $0x4] ss:$12 sps:$4 sm:$0xff]   ;;  %v2246_v23 = vld [vmem:[%s2889_s3 + $0xac] ss:$12 sps:$4 sm:$0xff]  }
   0x8   :  { %221 = vmatprep.subr.bf16.mxu0 %v1926_v6  ;;  %v1959_v21 = vld [vmem:[%s2888_s2 + $0x50] ss:$12 sps:$4 sm:$0xff]   ;;  %v1963_v24 = vld [vmem:[%s2888_s2 + $0x38] ss:$12 sps:$4 sm:$0xff]   ;;  %v39_v25 = vld [vmem:[%s2886_s0] sm:$0xf] }
   0x9   :  { %1719 = vmatpush3.bf16.msra.mxu1 %v1947_v12  ;;  %v37_v26 = vld [vmem:[%s2887_s1] sm:$0x1]  ;;  %v2261_v27 = vld [vmem:[%s2889_s3 + $0xa8] ss:$12 sps:$4 sm:$0xff]   ;;  %v2280_v30 = vld [vmem:[%s2889_s3 + $0x90] ss:$12 sps:$4 sm:$0xff]  }
   0xa   :  { %1720 = vmatprep.subr.bf16.mxu1 %v2118_v2  ;;  %38 = vst [vmem:[%s2895_s9] sm:$0x1] %v37_v26  ;;  %v2270_v28 = vld [vmem:[%s2889_s3 + $0x94] ss:$12 sps:$4 sm:$0xff]   ;;  %v2287_v31 = vld [vmem:[%s2889_s3 + $0x7c] ss:$12 sps:$4 sm:$0xff]  }
   0xb   :  { %222 = vmatpush1.bf16.msra.mxu0 %v1928_v7  ;;  %v1967_v29 = vld [vmem:[%s2888_s2 + $0x20] ss:$12 sps:$4 sm:$0xff]   ;;  %v1971_v32 = vld [vmem:[%s2888_s2 + $0x8] ss:$12 sps:$4 sm:$0xff]   ;;  %v2295_v33 = vld [vmem:[%s2889_s3 + $0x78] ss:$12 sps:$4 sm:$0xff]  }
   0xc   :  { %223 = vmatprep.subr.bf16.mxu0 %v1929_v8  ;;  %v2300_v34 = vld [vmem:[%s2889_s3 + $0x64] ss:$12 sps:$4 sm:$0xff]   ;;  %v2313_v36 = vld [vmem:[%s2889_s3 + $0x60] ss:$12 sps:$4 sm:$0xff]  }
   0xd   :  { %1721 = vmatpush3.bf16.msra.mxu1 %v1951_v15  ;;  %v2307_v35 = vld [vmem:[%s2889_s3 + $0xb0] ss:$12 sps:$4 sm:$0xff]   ;;  %v2321_v37 = vld [vmem:[%s2889_s3 + $0x4c] ss:$12 sps:$4 sm:$0xff]  }
   0xe   :  { %1722 = vmatprep.subr.bf16.mxu1 %v2118_v2 }
   0xf   :  { %224 = vmatpush1.bf16.msra.mxu0 %v1931_v9 }
  0x10   :  { %225 = vmatprep.subr.bf16.mxu0 %v1932_v11 }
  0x11   :  { %1723 = vmatpush3.bf16.msra.mxu1 %v1955_v18 }
  0x12   :  { %1724 = vmatprep.subr.bf16.mxu1 %v2118_v2 }
  0x13   :  { %226 = vmatpush1.bf16.msra.mxu0 %v1934_v13 }
  0x14   :  { %227 = vmatprep.subr.bf16.mxu0 %v1935_v14 }
  0x15   :  { %1725 = vmatpush3.bf16.msra.mxu1 %v1959_v21 }
  0x16   :  { %1726 = vmatprep.subr.bf16.mxu1 %v2118_v2 }
  0x17   :  { %228 = vmatpush1.bf16.msra.mxu0 %v1937_v16 }
  0x18   :  { %229 = vmatprep.subr.bf16.mxu0 %v1938_v17 }
  0x19   :  { %1727 = vmatpush3.bf16.msra.mxu1 %v1963_v24 }
  0x1a   :  { %1728 = vmatprep.subr.bf16.mxu1 %v2118_v2 }
  0x1b   :  { %230 = vmatpush1.bf16.msra.mxu0 %v1940_v19 }
  0x1c   :  { %231 = vmatprep.subr.bf16.mxu0 %v1941_v20 }
  0x1d   :  { %1729 = vmatpush3.bf16.msra.mxu1 %v1967_v29 }
  0x1e   :  { %1730 = vmatprep.subr.bf16.mxu1 %v2118_v2 }
  0x1f   :  { %232 = vmatpush1.bf16.msra.mxu0 %v1943_v22 }
  0x20   :  { %477 = vmatprep.subr.bf16.mxu0 %v2246_v23 }
  0x21   :  { %1731 = vmatpush3.bf16.msra.mxu1 %v1971_v32 }
  0x22   :  { %250 = vmatmul.mubr.bf16.vlgmr.msra.gmra.mxu0 %v39_v25  ;;  %1736 = vmatprep.subr.bf16.mxu1 %v2118_v2 }
  0x23   :  { %478 = vmatpush1.bf16.msra.mxu0 %v2261_v27  ;;  %509 = vmatprep.mubr.bf16.mxu0 %v2119_v3 }
  0x24   :  { %479 = vmatprep.subr.bf16.mxu0 %v2270_v28  ;;  %1733 = vmatmul.mubr.bf16.vlgmr.msra.gmra.mxu1 %v39_v25 }
  0x27   :  { %480 = vmatpush1.bf16.msra.mxu0 %v2280_v30 }
  0x28   :  { %481 = vmatprep.subr.bf16.mxu0 %v2287_v31 }
  0x2b   :  { %482 = vmatpush1.bf16.msra.mxu0 %v2295_v33 }
  0x2c   :  { %483 = vmatprep.subr.bf16.mxu0 %v2300_v34 }
  0x2d   :  { %15 = vsyncpa [#allocation3], 0  ;;  %1737 = vmatpush3.bf16.msra.mxu1 %v2307_v35  ;;  %v2327_v38 = vld [vmem:[%s2889_s3 + $0x98] ss:$12 sps:$4 sm:$0xff]   ;;  %1752 = vmatprep.mubr.msk.bf16.mxu1 %vm2120_vm0, %v2118_v2  ;;  %v2336_v39 = vld [vmem:[%s2889_s3 + $0x48] ss:$12 sps:$4 sm:$0xff]   ;;  %v74_v62 = vlaneseq }
  0x2e   :  { %1738 = vmatprep.subr.bf16.mxu1 %v2118_v2  ;;  %v2342_v40 = vld [vmem:[%s2889_s3 + $0x34] ss:$12 sps:$4 sm:$0xff]   ;;  %v2355_v42 = vld [vmem:[%s2889_s3 + $0x30] ss:$12 sps:$4 sm:$0xff]   ;;  %v2374_v45 = vld [vmem:[%s2889_s3 + $0x18] ss:$12 sps:$4 sm:$0xff]  }
  0x2f   :  { %484 = vmatpush1.bf16.msra.mxu0 %v2313_v36  ;;  %v2348_v41 = vld [vmem:[%s2889_s3 + $0x80] ss:$12 sps:$4 sm:$0xff]   ;;  %v2361_v43 = vld [vmem:[%s2889_s3 + $0x1c] ss:$12 sps:$4 sm:$0xff]   ;;  %v2380_v46 = vld [vmem:[%s2889_s3 + $0x4] ss:$12 sps:$4 sm:$0xff]  }
  0x30   :  { %485 = vmatprep.subr.bf16.mxu0 %v2321_v37  ;;  %v2367_v44 = vld [vmem:[%s2889_s3 + $0x68] ss:$12 sps:$4 sm:$0xff]   ;;  %v2386_v47 = vld [vmem:[%s2889_s3 + $0x50] ss:$12 sps:$4 sm:$0xff]   ;;  %v2393_v48 = vld [vmem:[%s2889_s3] ss:$12 sps:$4 sm:$0xff]  }
  0x31   :  { %1739 = vmatpush3.bf16.msra.mxu1 %v2327_v38  ;;  %v2398_v49 = vld [vmem:[%s2895_s9] sm:$0x1]  ;;  %v2405_v50 = vld [vmem:[%s2889_s3 + $0x38] ss:$12 sps:$4 sm:$0xff]   ;;  %v2426_v53 = vld [vmem:[%s2889_s3 + $0x8] ss:$12 sps:$4 sm:$0xff]  }
  0x32   :  { %1740 = vmatprep.subr.bf16.mxu1 %v2118_v2  ;;  %v332_v51 = vpack.c.bf16 %v2398_v49, %v2398_v49  ;;  %v2416_v52 = vld [vmem:[%s2889_s3 + $0x20] ss:$12 sps:$4 sm:$0xff]   ;;  %v75_v63 = vshrl.u32 %v74_v62, 7  ;;  %vm1408_vm1 = vcmask 1040384   ;;  %vm1410_vm2 = vcmask 1041408   ;;  %s2121_s15 = smov [#allocation2]  }
  0x33   :  { %486 = vmatpush1.bf16.msra.mxu0 %v2336_v39  ;;  %v72_v1 = vld [vmem:[%s2890_s4] sm:$0x7]  ;;  %vm1412_vm3 = vcmask 1042432   ;;  %vm1414_vm4 = vcmask 1043456   ;;  %vm1416_vm5 = vcmask 1044480   ;;  %vm1418_vm6 = vcmask 1045504  }
  0x34   :  { %487 = vmatprep.subr.bf16.mxu0 %v2342_v40  ;;  %v76_v0 = vsub.s32 0, %v75_v63  ;;  %v330_v4 = vld [vmem:[%s2891_s5] sm:$0x7]  ;;  %v80_v7 = vsub.s32 1, %v75_v63  ;;  %vm1420_vm7 = vcmask 1046528   ;;  %s1541_s16 = sshll.u32 %s2121_s15, 4  ;;  %s1542_s16 = int_to_ptr.vmem [resolvable:$true] %s1541_s16 }
  0x35   :  { %1741 = vmatpush3.bf16.msra.mxu1 %v2348_v41  ;;  %s2096_s17 = scalar_lea.vmem %s1542_s16, 128  ;;  %p2101_p1 = scmp.lt.s32.totalorder %s1542_s16, %s1542_s16 }
  0x36   :  { %1742 = vmatprep.subr.bf16.mxu1 %v2118_v2  ;;  %v77_v5 = vrot.slane %v72_v1, %v76_v0  ;;  %v2469_v6 = vrot.slane %v330_v4, %v76_v0  ;;  %v2473_v10 = vrot.slane %v330_v4, %v80_v7  ;;  %v81_v13 = vrot.slane %v72_v1, %v80_v7  ;;  %p2097_p0 = scmp.ne.s32.totalorder %s1542_s16, %s2096_s17  ;;  %p2102_p2 = scmp.lt.s32.totalorder %s2096_s17, %s2096_s17 }
  0x37   :  { %488 = vmatpush1.bf16.msra.mxu0 %v2355_v42 }
  0x38   :  { %489 = vmatprep.subr.bf16.mxu0 %v2361_v43  ;;  %p2103_p3 = por %p2102_p2, %p2101_p1 }
  0x39   :  { %1743 = vmatpush3.bf16.msra.mxu1 %v2367_v44 }
  0x3a   :  { %1744 = vmatprep.subr.bf16.mxu1 %v2118_v2  ;;  %p2104_p4 = pnand %p2103_p3, %p2097_p0 }
  0x3b   :  { %490 = vmatpush1.bf16.msra.mxu0 %v2374_v45 }
  0x3c   :  { %491 = vmatprep.subr.bf16.mxu0 %v2380_v46 }
  0x3d   :  { %1745 = vmatpush3.bf16.msra.mxu1 %v2386_v47 }
  0x3e   :  { %1746 = vmatprep.subr.bf16.mxu1 %v2118_v2 }
  0x3f   :  { %492 = vmatpush1.bf16.msra.mxu0 %v2393_v48 }
  0x40   :  { %580 = vmatprep.subr.bf16.mxu0 %v2246_v23 }
  0x41   :  { %1747 = vmatpush3.bf16.msra.mxu1 %v2405_v50 }
  0x42   :  { %510 = vmatmul.mubr.bf16.vlgmr.msra.gmra.mxu0 %v332_v51  ;;  %1748 = vmatprep.subr.bf16.mxu1 %v2118_v2 }
  0x43   :  { %581 = vmatpush1.bf16.msra.mxu0 %v2261_v27  ;;  %612 = vmatprep.mubr.bf16.mxu0 %v2119_v3 }
  0x44   :  { %582 = vmatprep.subr.bf16.mxu0 %v2270_v28 }
  0x45   :  { %1749 = vmatpush3.bf16.msra.mxu1 %v2416_v52 }
  0x46   :  { %1750 = vmatprep.subr.bf16.mxu1 %v2118_v2 }
  0x47   :  { %583 = vmatpush1.bf16.msra.mxu0 %v2280_v30 }
  0x48   :  { %584 = vmatprep.subr.bf16.mxu0 %v2287_v31 }
  0x49   :  { %1751 = vmatpush3.bf16.msra.mxu1 %v2426_v53 }
  0x4a   :  { %1756 = vmatprep.subr.bf16.mxu1 %v2118_v2 }
  0x4b   :  { %585 = vmatpush1.bf16.msra.mxu0 %v2295_v33 }
  0x4c   :  { %1753 = vmatmul.mubr.bf16.vlgmr.msra.gmra.mxu1 %v332_v51  ;;  %586 = vmatprep.subr.bf16.mxu0 %v2300_v34  ;;  %v84_v51 = vsub.s32 2, %v75_v63 }
  0x4d   :  { %1757 = vmatpush3.bf16.msra.mxu1 %v2307_v35  ;;  %1772 = vmatprep.mubr.msk.bf16.mxu1 %vm2120_vm0, %v2118_v2 }
  0x4e   :  { %1758 = vmatprep.subr.bf16.mxu1 %v2118_v2 }
  0x4f   :  { %587 = vmatpush1.bf16.msra.mxu0 %v2313_v36 }
  0x50   :  { %588 = vmatprep.subr.bf16.mxu0 %v2321_v37 }
  0x51   :  { %1759 = vmatpush3.bf16.msra.mxu1 %v2327_v38 }
  0x52   :  { %1760 = vmatprep.subr.bf16.mxu1 %v2118_v2 }
  0x53   :  { %589 = vmatpush1.bf16.msra.mxu0 %v2336_v39 }
  0x54   :  { %590 = vmatprep.subr.bf16.mxu0 %v2342_v40 }
  0x55   :  { %1761 = vmatpush3.bf16.msra.mxu1 %v2348_v41 }
  0x56   :  { %1762 = vmatprep.subr.bf16.mxu1 %v2118_v2 }
  0x57   :  { %591 = vmatpush1.bf16.msra.mxu0 %v2355_v42 }
  0x58   :  { %592 = vmatprep.subr.bf16.mxu0 %v2361_v43 }
  0x59   :  { %1763 = vmatpush3.bf16.msra.mxu1 %v2367_v44 }
  0x5a   :  { %1764 = vmatprep.subr.bf16.mxu1 %v2118_v2 }
  0x5b   :  { %593 = vmatpush1.bf16.msra.mxu0 %v2374_v45 }
  0x5c   :  { %594 = vmatprep.subr.bf16.mxu0 %v2380_v46 }
  0x5d   :  { %1765 = vmatpush3.bf16.msra.mxu1 %v2386_v47 }
  0x5e   :  { %1766 = vmatprep.subr.bf16.mxu1 %v2118_v2 }
  0x5f   :  { %595 = vmatpush1.bf16.msra.mxu0 %v2393_v48 }
  0x60   :  { %699 = vmatprep.subr.bf16.mxu0 %v2246_v23 }
  0x61   :  { %1767 = vmatpush3.bf16.msra.mxu1 %v2405_v50 }
  0x62   :  { %1768 = vmatprep.subr.bf16.mxu1 %v2118_v2 }
  0x65   :  { %1769 = vmatpush3.bf16.msra.mxu1 %v2416_v52 }
  0x66   :  { %1770 = vmatprep.subr.bf16.mxu1 %v2118_v2 }
  0x69   :  { %1771 = vmatpush3.bf16.msra.mxu1 %v2426_v53 }
  0x6a   :  { %1776 = vmatprep.subr.bf16.mxu1 %v2118_v2 }
  0xe2   :  { %v251_v54 = vpop.f32.mrf.mxu0 }
  0xe3   :  { %v2471_v9 = vadd.f32 %v251_v54, %v77_v5  ;;  %v2481_v54 = vrot.slane %v330_v4, %v84_v51 }
  0xe4   :  { %v253_v55 = vpop.f32.mrf.mxu0  ;;  %v292_v58 = vpop.f32.mrf.mxu1 }
  0xe5   :  { %v2478_v19 = vadd.f32 %v253_v55, %v81_v13 }
  0xe6   :  { %v255_v56 = vpop.f32.mrf.mxu0  ;;  %v1734_v59 = vpop.f32.mrf.mxu1 }
  0xe8   :  { %v256_v57 = vpop.f32.mrf.mxu0  ;;  %v295_v60 = vpop.f32.mrf.mxu1 }
  0xe9   :  { %v85_v57 = vrot.slane %v72_v1, %v84_v51 }
  0xea   :  { %v1735_v61 = vpop.f32.mrf.mxu1 }
  0xeb   :  { %v2484_v61 = vadd.f32 %v292_v58, %v85_v57 }
 0x102   :  { %v511_v8 = vpop.f32.mrf.mxu0 }
 0x103   :  { %v512_v11 = vadd.f32 %v511_v8, %v2469_v6 }
 0x104   :  { %v513_v12 = vpop.f32.mrf.mxu0 }
 0x105   :  { %v558_v14 = vadd.f32 %v512_v11, %v2471_v9  ;;  %v514_v17 = vadd.f32 %v513_v12, %v2473_v10 }
 0x106   :  { %v515_v15 = vpop.f32.mrf.mxu0 }
 0x107   :  { %v1601_v16 = vmul.f32 -1.442695, %v558_v14  ;;  %v565_v20 = vadd.f32 %v514_v17, %v2478_v19 }
 0x108   :  { %v516_v18 = vpop.f32.mrf.mxu0 }
 0x109   :  { %1992 = vpow2.f32 %v1601_v16  ;;  %v1602_v24 = vmul.f32 -1.442695, %v565_v20 }
 0x10b   :  { %1994 = vpow2.f32 %v1602_v24 }
 0x10c   :  { %v552_v21 = vpop.f32.mrf.mxu1 }
 0x10d   :  { %v553_v55 = vadd.f32 %v552_v21, %v2481_v54 }
 0x10e   :  { %v1754_v22 = vpop.f32.mrf.mxu1 }
 0x110   :  { %v555_v25 = vpop.f32.mrf.mxu1 }
 0x112   :  { %v1755_v26 = vpop.f32.mrf.mxu1 }
 0x116   :  { %v1993_v29 = vpop.eup %1992 }
 0x117   :  { %v562_v32 = vadd.f32 1.0, %v1993_v29 }
 0x118   :  { %v1995_v56 = vpop.eup %1994 }
 0x119   :  { %1996 = vrcp.f32 %v562_v32  ;;  %v569_v59 = vadd.f32 1.0, %v1995_v56 }
 0x11b   :  { %1998 = vrcp.f32 %v569_v59 }
 0x126   :  { %v1997_v60 = vpop.eup %1996 }
 0x127   :  { %v572_v62 = vmul.f32 %v1997_v60, %v553_v55 }
 0x128   :  { %v1999_v5 = vpop.eup %1998 }
 0x129   :  { %v573_v0 = vadd.f32 %v572_v62, %v2484_v61  ;;  %v575_v7 = vsub.f32 1.0, %v1999_v5  ;;  %v577_v63 = vmul.f32 %v1999_v5, %v2398_v49 }
 0x12b   :  { %2000 = vtanh.f32 %v573_v0 }
 0x138   :  { %v2001_v8 = vpop.eup %2000 }
 0x139   :  { %v576_v11 = vmul.f32 %v2001_v8, %v575_v7 }
 0x13b   :  { %v2488_v4 = vadd.f32 %v577_v63, %v576_v11 }
 0x13d   :  { %v579_v1 = vpack.c.bf16 %v2488_v4, %v2488_v4  ;;  %v690_v8 = vrot.slane %v2488_v4, 7 }
 0x13f   :  { %613 = vmatmul.mubr.bf16.vlgmr.msra.gmra.mxu0 %v579_v1  ;;  %1773 = vmatmul.mubr.bf16.vlgmr.msra.gmra.mxu1 %v579_v1 }
 0x140   :  { %700 = vmatpush1.bf16.msra.mxu0 %v2261_v27  ;;  %1777 = vmatpush3.bf16.msra.mxu1 %v2307_v35 }
 0x141   :  { %701 = vmatprep.subr.bf16.mxu0 %v2270_v28  ;;  %1778 = vmatprep.subr.bf16.mxu1 %v2118_v2 }
 0x142   :  { %731 = vmatprep.mubr.bf16.mxu0 %v2119_v3  ;;  %1792 = vmatprep.mubr.msk.bf16.mxu1 %vm2120_vm0, %v2118_v2 }
 0x144   :  { %702 = vmatpush1.bf16.msra.mxu0 %v2280_v30  ;;  %1779 = vmatpush3.bf16.msra.mxu1 %v2327_v38 }
 0x145   :  { %703 = vmatprep.subr.bf16.mxu0 %v2287_v31  ;;  %1780 = vmatprep.subr.bf16.mxu1 %v2118_v2 }
 0x148   :  { %704 = vmatpush1.bf16.msra.mxu0 %v2295_v33  ;;  %1781 = vmatpush3.bf16.msra.mxu1 %v2348_v41 }
 0x149   :  { %705 = vmatprep.subr.bf16.mxu0 %v2300_v34  ;;  %1782 = vmatprep.subr.bf16.mxu1 %v2118_v2 }
 0x14c   :  { %706 = vmatpush1.bf16.msra.mxu0 %v2313_v36  ;;  %1783 = vmatpush3.bf16.msra.mxu1 %v2367_v44 }
 0x14d   :  { %707 = vmatprep.subr.bf16.mxu0 %v2321_v37  ;;  %1784 = vmatprep.subr.bf16.mxu1 %v2118_v2 }
 0x150   :  { %708 = vmatpush1.bf16.msra.mxu0 %v2336_v39  ;;  %1785 = vmatpush3.bf16.msra.mxu1 %v2386_v47 }
 0x151   :  { %709 = vmatprep.subr.bf16.mxu0 %v2342_v40  ;;  %1786 = vmatprep.subr.bf16.mxu1 %v2118_v2 }
 0x154   :  { %710 = vmatpush1.bf16.msra.mxu0 %v2355_v42  ;;  %1787 = vmatpush3.bf16.msra.mxu1 %v2405_v50 }
 0x155   :  { %711 = vmatprep.subr.bf16.mxu0 %v2361_v43  ;;  %1788 = vmatprep.subr.bf16.mxu1 %v2118_v2 }
 0x158   :  { %712 = vmatpush1.bf16.msra.mxu0 %v2374_v45  ;;  %1789 = vmatpush3.bf16.msra.mxu1 %v2416_v52 }
 0x159   :  { %713 = vmatprep.subr.bf16.mxu0 %v2380_v46  ;;  %1790 = vmatprep.subr.bf16.mxu1 %v2118_v2 }
 0x15c   :  { %714 = vmatpush1.bf16.msra.mxu0 %v2393_v48  ;;  %1791 = vmatpush3.bf16.msra.mxu1 %v2426_v53 }
 0x15d   :  { %817 = vmatprep.subr.bf16.mxu0 %v2246_v23  ;;  %1796 = vmatprep.subr.bf16.mxu1 %v2118_v2 }
 0x1ff   :  { %v614_v49 = vpop.f32.mrf.mxu0  ;;  %v655_v58 = vpop.f32.mrf.mxu1 }
 0x200   :  { %v615_v12 = vadd.f32 %v614_v49, %v2469_v6  ;;  %v656_v57 = vadd.f32 %v655_v58, %v2481_v54 }
 0x201   :  { %v616_v13 = vpop.f32.mrf.mxu0  ;;  %v1774_v14 = vpop.f32.mrf.mxu1 }
 0x202   :  { %v662_v15 = vrot.slane %v615_v12, 7  ;;  %v617_v16 = vadd.f32 %v616_v13, %v2473_v10  ;;  %v682_v55 = vrot.slane %v656_v57, 7 }
 0x203   :  { %v618_v17 = vpop.f32.mrf.mxu0  ;;  %v658_v18 = vpop.f32.mrf.mxu1 }
 0x204   :  { %v664_v20 = vadd.f32 %v662_v15, %v2471_v9  ;;  %v672_v25 = vrot.slane %v617_v16, 7 }
 0x205   :  { %v619_v21 = vpop.f32.mrf.mxu0  ;;  %v1775_v22 = vpop.f32.mrf.mxu1 }
 0x206   :  { %v1603_v24 = vmul.f32 -1.442695, %v664_v20  ;;  %v674_v26 = vadd.f32 %v672_v25, %v2478_v19 }
 0x208   :  { %2002 = vpow2.f32 %v1603_v24  ;;  %v1604_v29 = vmul.f32 -1.442695, %v674_v26 }
 0x20a   :  { %2004 = vpow2.f32 %v1604_v29 }
 0x215   :  { %v2003_v32 = vpop.eup %2002 }
 0x216   :  { %v668_v51 = vadd.f32 1.0, %v2003_v32 }
 0x217   :  { %v2005_v56 = vpop.eup %2004 }
 0x218   :  { %2006 = vrcp.f32 %v668_v51  ;;  %v678_v59 = vadd.f32 1.0, %v2005_v56 }
 0x21a   :  { %2008 = vrcp.f32 %v678_v59 }
 0x225   :  { %v2007_v60 = vpop.eup %2006 }
 0x226   :  { %v684_v62 = vmul.f32 %v2007_v60, %v682_v55 }
 0x227   :  { %v2009_v5 = vpop.eup %2008 }
 0x228   :  { %v685_v0 = vadd.f32 %v684_v62, %v2484_v61  ;;  %v687_v7 = vsub.f32 1.0, %v2009_v5  ;;  %v692_v1 = vmul.f32 %v2009_v5, %v690_v8 }
 0x22a   :  { %2010 = vtanh.f32 %v685_v0 }
 0x237   :  { %v2011_v11 = vpop.eup %2010 }
 0x238   :  { %v688_v63 = vmul.f32 %v2011_v11, %v687_v7 }
 0x23a   :  { %v2534_v49 = vadd.f32 %v692_v1, %v688_v63 }
 0x23c   :  { %v694_v58 = vpack.c.bf16 %v2534_v49, %v2534_v49  ;;  %v809_v1 = vrot.slane %v2534_v49, 7 }
 0x23e   :  { %v696_v12 = vshrl.u32 %v694_v58, 16 }
 0x240   :  { %732 = vmatmul.mubr.bf16.vlgmr.msra.gmra.mxu0 %v696_v12  ;;  %1793 = vmatmul.mubr.bf16.vlgmr.msra.gmra.mxu1 %v696_v12 }
 0x241   :  { %818 = vmatpush1.bf16.msra.mxu0 %v2261_v27  ;;  %1797 = vmatpush3.bf16.msra.mxu1 %v2307_v35 }
 0x242   :  { %819 = vmatprep.subr.bf16.mxu0 %v2270_v28  ;;  %1798 = vmatprep.subr.bf16.mxu1 %v2118_v2 }
 0x243   :  { %849 = vmatprep.mubr.bf16.mxu0 %v2119_v3  ;;  %1812 = vmatprep.mubr.msk.bf16.mxu1 %vm2120_vm0, %v2118_v2 }
 0x245   :  { %820 = vmatpush1.bf16.msra.mxu0 %v2280_v30  ;;  %1799 = vmatpush3.bf16.msra.mxu1 %v2327_v38 }
 0x246   :  { %821 = vmatprep.subr.bf16.mxu0 %v2287_v31  ;;  %1800 = vmatprep.subr.bf16.mxu1 %v2118_v2 }
 0x249   :  { %822 = vmatpush1.bf16.msra.mxu0 %v2295_v33  ;;  %1801 = vmatpush3.bf16.msra.mxu1 %v2348_v41 }
 0x24a   :  { %823 = vmatprep.subr.bf16.mxu0 %v2300_v34  ;;  %1802 = vmatprep.subr.bf16.mxu1 %v2118_v2 }
 0x24d   :  { %824 = vmatpush1.bf16.msra.mxu0 %v2313_v36  ;;  %1803 = vmatpush3.bf16.msra.mxu1 %v2367_v44 }
 0x24e   :  { %825 = vmatprep.subr.bf16.mxu0 %v2321_v37  ;;  %1804 = vmatprep.subr.bf16.mxu1 %v2118_v2 }
 0x251   :  { %826 = vmatpush1.bf16.msra.mxu0 %v2336_v39  ;;  %1805 = vmatpush3.bf16.msra.mxu1 %v2386_v47 }
 0x252   :  { %827 = vmatprep.subr.bf16.mxu0 %v2342_v40  ;;  %1806 = vmatprep.subr.bf16.mxu1 %v2118_v2 }
 0x255   :  { %828 = vmatpush1.bf16.msra.mxu0 %v2355_v42  ;;  %1807 = vmatpush3.bf16.msra.mxu1 %v2405_v50 }
 0x256   :  { %829 = vmatprep.subr.bf16.mxu0 %v2361_v43  ;;  %1808 = vmatprep.subr.bf16.mxu1 %v2118_v2 }
 0x259   :  { %830 = vmatpush1.bf16.msra.mxu0 %v2374_v45  ;;  %1809 = vmatpush3.bf16.msra.mxu1 %v2416_v52 }
 0x25a   :  { %831 = vmatprep.subr.bf16.mxu0 %v2380_v46  ;;  %1810 = vmatprep.subr.bf16.mxu1 %v2118_v2 }
 0x25d   :  { %832 = vmatpush1.bf16.msra.mxu0 %v2393_v48  ;;  %1811 = vmatpush3.bf16.msra.mxu1 %v2426_v53 }
 0x25e   :  { %937 = vmatprep.subr.bf16.mxu0 %v2246_v23  ;;  %1816 = vmatprep.subr.bf16.mxu1 %v2118_v2 }
 0x300   :  { %v733_v13 = vpop.f32.mrf.mxu0  ;;  %v774_v14 = vpop.f32.mrf.mxu1 }
 0x301   :  { %v734_v15 = vadd.f32 %v733_v13, %v2469_v6  ;;  %v775_v60 = vadd.f32 %v774_v14, %v2481_v54  ;;  %v1409_v14 = vsel %vm1408_vm1, %v2488_v4, %v2534_v49 }
 0x302   :  { %v735_v16 = vpop.f32.mrf.mxu0  ;;  %v1794_v17 = vpop.f32.mrf.mxu1 }
 0x303   :  { %v781_v18 = vrot.slane %v734_v15, 6  ;;  %v736_v20 = vadd.f32 %v735_v16, %v2473_v10  ;;  %v801_v0 = vrot.slane %v775_v60, 6 }
 0x304   :  { %v737_v21 = vpop.f32.mrf.mxu0  ;;  %v777_v22 = vpop.f32.mrf.mxu1 }
 0x305   :  { %v783_v24 = vadd.f32 %v781_v18, %v2471_v9  ;;  %v791_v32 = vrot.slane %v736_v20, 6 }
 0x306   :  { %v738_v25 = vpop.f32.mrf.mxu0  ;;  %v1795_v26 = vpop.f32.mrf.mxu1 }
 0x307   :  { %v1605_v29 = vmul.f32 -1.442695, %v783_v24  ;;  %v793_v51 = vadd.f32 %v791_v32, %v2478_v19 }
 0x309   :  { %2012 = vpow2.f32 %v1605_v29  ;;  %v1606_v56 = vmul.f32 -1.442695, %v793_v51 }
 0x30b   :  { %2014 = vpow2.f32 %v1606_v56 }
 0x316   :  { %v2013_v57 = vpop.eup %2012 }
 0x317   :  { %v787_v59 = vadd.f32 1.0, %v2013_v57 }
 0x318   :  { %v2015_v55 = vpop.eup %2014 }
 0x319   :  { %2016 = vrcp.f32 %v787_v59  ;;  %v797_v62 = vadd.f32 1.0, %v2015_v55 }
 0x31b   :  { %2018 = vrcp.f32 %v797_v62 }
 0x326   :  { %v2017_v5 = vpop.eup %2016 }
 0x327   :  { %v803_v7 = vmul.f32 %v2017_v5, %v801_v0 }
 0x328   :  { %v2019_v11 = vpop.eup %2018 }
 0x329   :  { %v804_v8 = vadd.f32 %v803_v7, %v2484_v61  ;;  %v806_v63 = vsub.f32 1.0, %v2019_v11  ;;  %v811_v13 = vmul.f32 %v2019_v11, %v809_v1 }
 0x32b   :  { %2020 = vtanh.f32 %v804_v8 }
 0x338   :  { %v2021_v58 = vpop.eup %2020 }
 0x339   :  { %v807_v12 = vmul.f32 %v2021_v58, %v806_v63 }
 0x33b   :  { %v2580_v15 = vadd.f32 %v811_v13, %v807_v12 }
 0x33d   :  { %v813_v16 = vpack.c.bf16 %v2580_v15, %v2580_v15  ;;  %v2587_v17 = vsel %vm1410_vm2, %v1409_v14, %v2580_v15  ;;  %v927_v14 = vrot.slane %v2580_v15, 7 }
 0x33f   :  { %v815_v18 = vrot.slane %v813_v16, 1 }
 0x341   :  { %850 = vmatmul.mubr.bf16.vlgmr.msra.gmra.mxu0 %v815_v18  ;;  %1813 = vmatmul.mubr.bf16.vlgmr.msra.gmra.mxu1 %v815_v18 }
 0x342   :  { %938 = vmatpush1.bf16.msra.mxu0 %v2261_v27  ;;  %1817 = vmatpush3.bf16.msra.mxu1 %v2307_v35 }
 0x343   :  { %939 = vmatprep.subr.bf16.mxu0 %v2270_v28  ;;  %1818 = vmatprep.subr.bf16.mxu1 %v2118_v2 }
 0x344   :  { %969 = vmatprep.mubr.bf16.mxu0 %v2119_v3  ;;  %1832 = vmatprep.mubr.msk.bf16.mxu1 %vm2120_vm0, %v2118_v2 }
 0x346   :  { %940 = vmatpush1.bf16.msra.mxu0 %v2280_v30  ;;  %1819 = vmatpush3.bf16.msra.mxu1 %v2327_v38 }
 0x347   :  { %941 = vmatprep.subr.bf16.mxu0 %v2287_v31  ;;  %1820 = vmatprep.subr.bf16.mxu1 %v2118_v2 }
 0x34a   :  { %942 = vmatpush1.bf16.msra.mxu0 %v2295_v33  ;;  %1821 = vmatpush3.bf16.msra.mxu1 %v2348_v41 }
 0x34b   :  { %943 = vmatprep.subr.bf16.mxu0 %v2300_v34  ;;  %1822 = vmatprep.subr.bf16.mxu1 %v2118_v2 }
 0x34e   :  { %944 = vmatpush1.bf16.msra.mxu0 %v2313_v36  ;;  %1823 = vmatpush3.bf16.msra.mxu1 %v2367_v44 }
 0x34f   :  { %945 = vmatprep.subr.bf16.mxu0 %v2321_v37  ;;  %1824 = vmatprep.subr.bf16.mxu1 %v2118_v2 }
 0x352   :  { %946 = vmatpush1.bf16.msra.mxu0 %v2336_v39  ;;  %1825 = vmatpush3.bf16.msra.mxu1 %v2386_v47 }
 0x353   :  { %947 = vmatprep.subr.bf16.mxu0 %v2342_v40  ;;  %1826 = vmatprep.subr.bf16.mxu1 %v2118_v2 }
 0x356   :  { %948 = vmatpush1.bf16.msra.mxu0 %v2355_v42  ;;  %1827 = vmatpush3.bf16.msra.mxu1 %v2405_v50 }
 0x357   :  { %949 = vmatprep.subr.bf16.mxu0 %v2361_v43  ;;  %1828 = vmatprep.subr.bf16.mxu1 %v2118_v2 }
 0x35a   :  { %950 = vmatpush1.bf16.msra.mxu0 %v2374_v45  ;;  %1829 = vmatpush3.bf16.msra.mxu1 %v2416_v52 }
 0x35b   :  { %951 = vmatprep.subr.bf16.mxu0 %v2380_v46  ;;  %1830 = vmatprep.subr.bf16.mxu1 %v2118_v2 }
 0x35e   :  { %952 = vmatpush1.bf16.msra.mxu0 %v2393_v48  ;;  %1831 = vmatpush3.bf16.msra.mxu1 %v2426_v53 }
 0x35f   :  { %1055 = vmatprep.subr.bf16.mxu0 %v2246_v23  ;;  %1836 = vmatprep.subr.bf16.mxu1 %v2118_v2 }
 0x401   :  { %v851_v4 = vpop.f32.mrf.mxu0  ;;  %v892_v49 = vpop.f32.mrf.mxu1 }
 0x402   :  { %v852_v20 = vadd.f32 %v851_v4, %v2469_v6  ;;  %v893_v7 = vadd.f32 %v892_v49, %v2481_v54 }
 0x403   :  { %v853_v21 = vpop.f32.mrf.mxu0  ;;  %v1814_v22 = vpop.f32.mrf.mxu1 }
 0x404   :  { %v899_v24 = vrot.slane %v852_v20, 5  ;;  %v854_v25 = vadd.f32 %v853_v21, %v2473_v10  ;;  %v919_v11 = vrot.slane %v893_v7, 5 }
 0x405   :  { %v855_v26 = vpop.f32.mrf.mxu0  ;;  %v895_v29 = vpop.f32.mrf.mxu1 }
 0x406   :  { %v901_v32 = vadd.f32 %v899_v24, %v2471_v9  ;;  %v909_v59 = vrot.slane %v854_v25, 5 }
 0x407   :  { %v856_v51 = vpop.f32.mrf.mxu0  ;;  %v1815_v56 = vpop.f32.mrf.mxu1 }
 0x408   :  { %v1607_v57 = vmul.f32 -1.442695, %v901_v32  ;;  %v911_v55 = vadd.f32 %v909_v59, %v2478_v19 }
 0x40a   :  { %2022 = vpow2.f32 %v1607_v57  ;;  %v1608_v60 = vmul.f32 -1.442695, %v911_v55 }
 0x40c   :  { %2024 = vpow2.f32 %v1608_v60 }
 0x417   :  { %v2023_v62 = vpop.eup %2022 }
 0x418   :  { %v905_v0 = vadd.f32 1.0, %v2023_v62 }
 0x419   :  { %v2025_v5 = vpop.eup %2024 }
 0x41a   :  { %2026 = vrcp.f32 %v905_v0  ;;  %v915_v8 = vadd.f32 1.0, %v2025_v5 }
 0x41c   :  { %2028 = vrcp.f32 %v915_v8 }
 0x427   :  { %v2027_v63 = vpop.eup %2026 }
 0x428   :  { %v921_v1 = vmul.f32 %v2027_v63, %v919_v11 }
 0x429   :  { %v2029_v12 = vpop.eup %2028 }
 0x42a   :  { %v922_v58 = vadd.f32 %v921_v1, %v2484_v61  ;;  %v924_v13 = vsub.f32 1.0, %v2029_v12  ;;  %v929_v4 = vmul.f32 %v2029_v12, %v927_v14 }
 0x42c   :  { %2030 = vtanh.f32 %v922_v58 }
 0x439   :  { %v2031_v16 = vpop.eup %2030 }
 0x43a   :  { %v925_v18 = vmul.f32 %v2031_v16, %v924_v13 }
 0x43c   :  { %v2631_v20 = vadd.f32 %v929_v4, %v925_v18 }
 0x43e   :  { %v931_v49 = vpack.c.bf16 %v2631_v20, %v2631_v20  ;;  %v2637_v21 = vsel %vm1412_vm3, %v2587_v17, %v2631_v20  ;;  %v1047_v4 = vrot.slane %v2631_v20, 7 }
 0x440   :  { %v933_v22 = vshrl.u32 %v931_v49, 16 }
 0x442   :  { %v935_v24 = vrot.slane %v933_v22, 1 }
 0x444   :  { %970 = vmatmul.mubr.bf16.vlgmr.msra.gmra.mxu0 %v935_v24  ;;  %1833 = vmatmul.mubr.bf16.vlgmr.msra.gmra.mxu1 %v935_v24 }
 0x445   :  { %1056 = vmatpush1.bf16.msra.mxu0 %v2261_v27  ;;  %1837 = vmatpush3.bf16.msra.mxu1 %v2307_v35 }
 0x446   :  { %1057 = vmatprep.subr.bf16.mxu0 %v2270_v28  ;;  %1838 = vmatprep.subr.bf16.mxu1 %v2118_v2 }
 0x447   :  { %1087 = vmatprep.mubr.bf16.mxu0 %v2119_v3  ;;  %1852 = vmatprep.mubr.msk.bf16.mxu1 %vm2120_vm0, %v2118_v2 }
 0x449   :  { %1058 = vmatpush1.bf16.msra.mxu0 %v2280_v30  ;;  %1839 = vmatpush3.bf16.msra.mxu1 %v2327_v38 }
 0x44a   :  { %1059 = vmatprep.subr.bf16.mxu0 %v2287_v31  ;;  %1840 = vmatprep.subr.bf16.mxu1 %v2118_v2 }
 0x44d   :  { %1060 = vmatpush1.bf16.msra.mxu0 %v2295_v33  ;;  %1841 = vmatpush3.bf16.msra.mxu1 %v2348_v41 }
 0x44e   :  { %1061 = vmatprep.subr.bf16.mxu0 %v2300_v34  ;;  %1842 = vmatprep.subr.bf16.mxu1 %v2118_v2 }
 0x451   :  { %1062 = vmatpush1.bf16.msra.mxu0 %v2313_v36  ;;  %1843 = vmatpush3.bf16.msra.mxu1 %v2367_v44 }
 0x452   :  { %1063 = vmatprep.subr.bf16.mxu0 %v2321_v37  ;;  %1844 = vmatprep.subr.bf16.mxu1 %v2118_v2 }
 0x455   :  { %1064 = vmatpush1.bf16.msra.mxu0 %v2336_v39  ;;  %1845 = vmatpush3.bf16.msra.mxu1 %v2386_v47 }
 0x456   :  { %1065 = vmatprep.subr.bf16.mxu0 %v2342_v40  ;;  %1846 = vmatprep.subr.bf16.mxu1 %v2118_v2 }
 0x459   :  { %1066 = vmatpush1.bf16.msra.mxu0 %v2355_v42  ;;  %1847 = vmatpush3.bf16.msra.mxu1 %v2405_v50 }
 0x45a   :  { %1067 = vmatprep.subr.bf16.mxu0 %v2361_v43  ;;  %1848 = vmatprep.subr.bf16.mxu1 %v2118_v2 }
 0x45d   :  { %1068 = vmatpush1.bf16.msra.mxu0 %v2374_v45  ;;  %1849 = vmatpush3.bf16.msra.mxu1 %v2416_v52 }
 0x45e   :  { %1069 = vmatprep.subr.bf16.mxu0 %v2380_v46  ;;  %1850 = vmatprep.subr.bf16.mxu1 %v2118_v2 }
 0x461   :  { %1070 = vmatpush1.bf16.msra.mxu0 %v2393_v48  ;;  %1851 = vmatpush3.bf16.msra.mxu1 %v2426_v53 }
 0x462   :  { %1175 = vmatprep.subr.bf16.mxu0 %v2246_v23  ;;  %1856 = vmatprep.subr.bf16.mxu1 %v2118_v2 }
 0x504   :  { %v971_v15 = vpop.f32.mrf.mxu0  ;;  %v1012_v17 = vpop.f32.mrf.mxu1 }
 0x505   :  { %v972_v25 = vadd.f32 %v971_v15, %v2469_v6  ;;  %v1013_v63 = vadd.f32 %v1012_v17, %v2481_v54 }
 0x506   :  { %v973_v26 = vpop.f32.mrf.mxu0  ;;  %v1834_v29 = vpop.f32.mrf.mxu1 }
 0x507   :  { %v1019_v32 = vrot.slane %v972_v25, 4  ;;  %v974_v51 = vadd.f32 %v973_v26, %v2473_v10  ;;  %v1039_v58 = vrot.slane %v1013_v63, 4  ;;  %v2076_v63 = vld [vmem:[%s2889_s3 + $0x90] ss:$12 sps:$4 sm:$0xff]  }
 0x508   :  { %v975_v56 = vpop.f32.mrf.mxu0  ;;  %v1015_v57 = vpop.f32.mrf.mxu1 }
 0x509   :  { %v1021_v59 = vadd.f32 %v1019_v32, %v2471_v9  ;;  %v1029_v0 = vrot.slane %v974_v51, 4 }
 0x50a   :  { %v976_v55 = vpop.f32.mrf.mxu0  ;;  %v1835_v60 = vpop.f32.mrf.mxu1 }
 0x50b   :  { %v1609_v62 = vmul.f32 -1.442695, %v1021_v59  ;;  %v1031_v23 = vadd.f32 %v1029_v0, %v2478_v19 }
 0x50d   :  { %2032 = vpow2.f32 %v1609_v62  ;;  %v1610_v5 = vmul.f32 -1.442695, %v1031_v23 }
 0x50f   :  { %2034 = vpow2.f32 %v1610_v5 }
 0x51a   :  { %v2033_v7 = vpop.eup %2032 }
 0x51b   :  { %v1025_v8 = vadd.f32 1.0, %v2033_v7  ;;  %v2073_v7 = vld [vmem:[%s2889_s3 + $0xa8] ss:$12 sps:$4 sm:$0xff]  }
 0x51c   :  { %v2035_v11 = vpop.eup %2034 }
 0x51d   :  { %2036 = vrcp.f32 %v1025_v8  ;;  %v1035_v1 = vadd.f32 1.0, %v2035_v11  ;;  %v2074_v8 = vld [vmem:[%s2889_s3 + $0xb0] ss:$12 sps:$4 sm:$0xff]   ;;  %v2075_v11 = vld [vmem:[%s2889_s3 + $0x94] ss:$12 sps:$4 sm:$0xff]  }
 0x51f   :  { %2038 = vrcp.f32 %v1035_v1  ;;  %v2077_v1 = vld [vmem:[%s2889_s3 + $0x98] ss:$12 sps:$4 sm:$0xff]  }
 0x52a   :  { %v2037_v12 = vpop.eup %2036 }
 0x52b   :  { %v1041_v13 = vmul.f32 %v2037_v12, %v1039_v58  ;;  %v2078_v58 = vld [vmem:[%s2889_s3 + $0x7c] ss:$12 sps:$4 sm:$0xff]   ;;  %v2080_v12 = vld [vmem:[%s2889_s3 + $0x80] ss:$12 sps:$4 sm:$0xff]  }
 0x52c   :  { %v2039_v16 = vpop.eup %2038 }
 0x52d   :  { %v1042_v14 = vadd.f32 %v1041_v13, %v2484_v61  ;;  %v1044_v18 = vsub.f32 1.0, %v2039_v16  ;;  %v1049_v24 = vmul.f32 %v2039_v16, %v1047_v4  ;;  %v2081_v13 = vld [vmem:[%s2889_s3 + $0x64] ss:$12 sps:$4 sm:$0xff]   ;;  %v2083_v16 = vld [vmem:[%s2889_s3 + $0x68] ss:$12 sps:$4 sm:$0xff]  }
 0x52e   :  { %v2085_v4 = vld [vmem:[%s2889_s3 + $0x48] ss:$12 sps:$4 sm:$0xff]  }
 0x52f   :  { %2040 = vtanh.f32 %v1042_v14  ;;  %v2082_v14 = vld [vmem:[%s2889_s3 + $0x60] ss:$12 sps:$4 sm:$0xff]  }
 0x53c   :  { %v2041_v49 = vpop.eup %2040 }
 0x53d   :  { %v1045_v22 = vmul.f32 %v2041_v49, %v1044_v18  ;;  %v2084_v18 = vld [vmem:[%s2889_s3 + $0x4c] ss:$12 sps:$4 sm:$0xff]   ;;  %v2086_v49 = vld [vmem:[%s2889_s3 + $0x50] ss:$12 sps:$4 sm:$0xff]  }
 0x53f   :  { %v2681_v15 = vadd.f32 %v1049_v24, %v1045_v22  ;;  %v2087_v22 = vld [vmem:[%s2889_s3 + $0x34] ss:$12 sps:$4 sm:$0xff]   ;;  %v2088_v24 = vld [vmem:[%s2889_s3 + $0x30] ss:$12 sps:$4 sm:$0xff]  }
 0x541   :  { %v1051_v17 = vpack.c.bf16 %v2681_v15, %v2681_v15  ;;  %v2687_v25 = vsel %vm1414_vm4, %v2637_v21, %v2681_v15  ;;  %v1165_v56 = vrot.slane %v2681_v15, 7  ;;  %v2089_v15 = vld [vmem:[%s2889_s3 + $0x38] ss:$12 sps:$4 sm:$0xff]  }
 0x543   :  { %v1053_v26 = vrot.slane %v1051_v17, 2  ;;  %v2090_v17 = vld [vmem:[%s2889_s3 + $0x1c] ss:$12 sps:$4 sm:$0xff]  }
 0x545   :  { %1088 = vmatmul.mubr.bf16.vlgmr.msra.gmra.mxu0 %v1053_v26  ;;  %1853 = vmatmul.mubr.bf16.vlgmr.msra.gmra.mxu1 %v1053_v26  ;;  %v2092_v26 = vld [vmem:[%s2889_s3 + $0x20] ss:$12 sps:$4 sm:$0xff]  }
 0x546   :  { %1176 = vmatpush1.bf16.msra.mxu0 %v2261_v27  ;;  %1857 = vmatpush3.bf16.msra.mxu1 %v2307_v35  ;;  %v2072_v27 = vld [vmem:[%s2889_s3 + $0xac] ss:$12 sps:$4 sm:$0xff]  }
 0x547   :  { %1177 = vmatprep.subr.bf16.mxu0 %v2270_v28  ;;  %1858 = vmatprep.subr.bf16.mxu1 %v2118_v2 }
 0x548   :  { %1207 = vmatprep.mubr.bf16.mxu0 %v2119_v3  ;;  %1872 = vmatprep.mubr.msk.bf16.mxu1 %vm2120_vm0, %v2118_v2 }
 0x54a   :  { %1178 = vmatpush1.bf16.msra.mxu0 %v2280_v30  ;;  %1859 = vmatpush3.bf16.msra.mxu1 %v2327_v38 }
 0x54b   :  { %1179 = vmatprep.subr.bf16.mxu0 %v2287_v31  ;;  %1860 = vmatprep.subr.bf16.mxu1 %v2118_v2 }
 0x54e   :  { %1180 = vmatpush1.bf16.msra.mxu0 %v2295_v33  ;;  %1861 = vmatpush3.bf16.msra.mxu1 %v2348_v41 }
 0x54f   :  { %1181 = vmatprep.subr.bf16.mxu0 %v2300_v34  ;;  %1862 = vmatprep.subr.bf16.mxu1 %v2118_v2 }
 0x552   :  { %1182 = vmatpush1.bf16.msra.mxu0 %v2313_v36  ;;  %1863 = vmatpush3.bf16.msra.mxu1 %v2367_v44 }
 0x553   :  { %1183 = vmatprep.subr.bf16.mxu0 %v2321_v37  ;;  %1864 = vmatprep.subr.bf16.mxu1 %v2118_v2 }
 0x556   :  { %1184 = vmatpush1.bf16.msra.mxu0 %v2336_v39  ;;  %1865 = vmatpush3.bf16.msra.mxu1 %v2386_v47 }
 0x557   :  { %1185 = vmatprep.subr.bf16.mxu0 %v2342_v40  ;;  %1866 = vmatprep.subr.bf16.mxu1 %v2118_v2 }
 0x55a   :  { %1186 = vmatpush1.bf16.msra.mxu0 %v2355_v42  ;;  %1867 = vmatpush3.bf16.msra.mxu1 %v2405_v50 }
 0x55b   :  { %1187 = vmatprep.subr.bf16.mxu0 %v2361_v43  ;;  %1868 = vmatprep.subr.bf16.mxu1 %v2118_v2 }
 0x55e   :  { %1188 = vmatpush1.bf16.msra.mxu0 %v2374_v45  ;;  %1869 = vmatpush3.bf16.msra.mxu1 %v2416_v52 }
 0x55f   :  { %1189 = vmatprep.subr.bf16.mxu0 %v2380_v46  ;;  %1870 = vmatprep.subr.bf16.mxu1 %v2118_v2 }
 0x562   :  { %1190 = vmatpush1.bf16.msra.mxu0 %v2393_v48  ;;  %1871 = vmatpush3.bf16.msra.mxu1 %v2426_v53 }
 0x563   :  { %1293 = vmatprep.subr.bf16.mxu0 %v2072_v27  ;;  %1876 = vmatprep.subr.bf16.mxu1 %v2118_v2  ;;  %v2093_v27 = vld [vmem:[%s2889_s3 + $0x4] ss:$12 sps:$4 sm:$0xff]  }
 0x605   :  { %v1089_v28 = vpop.f32.mrf.mxu0  ;;  %v1130_v30 = vpop.f32.mrf.mxu1 }
 0x606   :  { %v1090_v31 = vadd.f32 %v1089_v28, %v2469_v6  ;;  %v1131_v50 = vadd.f32 %v1130_v30, %v2481_v54  ;;  %v2094_v28 = vld [vmem:[%s2889_s3] ss:$12 sps:$4 sm:$0xff]   ;;  %v2095_v30 = vld [vmem:[%s2889_s3 + $0x8] ss:$12 sps:$4 sm:$0xff]  }
 0x607   :  { %v1091_v33 = vpop.f32.mrf.mxu0  ;;  %v1854_v34 = vpop.f32.mrf.mxu1 }
 0x608   :  { %v1137_v35 = vrot.slane %v1090_v31, 3  ;;  %v1092_v36 = vadd.f32 %v1091_v33, %v2473_v10  ;;  %v1157_v53 = vrot.slane %v1131_v50, 3 }
 0x609   :  { %v1093_v37 = vpop.f32.mrf.mxu0  ;;  %v1133_v38 = vpop.f32.mrf.mxu1 }
 0x60a   :  { %v1139_v39 = vadd.f32 %v1137_v35, %v2471_v9  ;;  %v1147_v43 = vrot.slane %v1092_v36, 3 }
 0x60b   :  { %v1094_v40 = vpop.f32.mrf.mxu0  ;;  %v1855_v41 = vpop.f32.mrf.mxu1 }
 0x60c   :  { %v1611_v42 = vmul.f32 -1.442695, %v1139_v39  ;;  %v1149_v44 = vadd.f32 %v1147_v43, %v2478_v19 }
 0x60e   :  { %2042 = vpow2.f32 %v1611_v42  ;;  %v1612_v45 = vmul.f32 -1.442695, %v1149_v44 }
 0x610   :  { %2044 = vpow2.f32 %v1612_v45 }
 0x61b   :  { %v2043_v46 = vpop.eup %2042 }
 0x61c   :  { %v1143_v47 = vadd.f32 1.0, %v2043_v46 }
 0x61d   :  { %v2045_v48 = vpop.eup %2044 }
 0x61e   :  { %2046 = vrcp.f32 %v1143_v47  ;;  %v1153_v52 = vadd.f32 1.0, %v2045_v48 }
 0x620   :  { %2048 = vrcp.f32 %v1153_v52 }
 0x62b   :  { %v2047_v20 = vpop.eup %2046 }
 0x62c   :  { %v1159_v21 = vmul.f32 %v2047_v20, %v1157_v53 }
 0x62d   :  { %v2049_v32 = vpop.eup %2048 }
 0x62e   :  { %v1160_v29 = vadd.f32 %v1159_v21, %v2484_v61  ;;  %v1162_v51 = vsub.f32 1.0, %v2049_v32  ;;  %v1167_v55 = vmul.f32 %v2049_v32, %v1165_v56 }
 0x630   :  { %2050 = vtanh.f32 %v1160_v29 }
 0x63d   :  { %v2051_v57 = vpop.eup %2050 }
 0x63e   :  { %v1163_v59 = vmul.f32 %v2051_v57, %v1162_v51 }
 0x640   :  { %v2733_v60 = vadd.f32 %v1167_v55, %v1163_v59 }
 0x642   :  { %v1169_v62 = vpack.c.bf16 %v2733_v60, %v2733_v60  ;;  %v2739_v0 = vsel %vm1416_vm5, %v2687_v25, %v2733_v60  ;;  %v2091_v25 = vld [vmem:[%s2889_s3 + $0x18] ss:$12 sps:$4 sm:$0xff]   ;;  %v1285_v59 = vrot.slane %v2733_v60, 7 }
 0x643   :  { %v1984_v60 = vld [vmem:[%s2892_s6 + $0x38] sm:$0xff]  }
 0x644   :  { %v1171_v23 = vshrl.u32 %v1169_v62, 16 }
 0x646   :  { %v1173_v5 = vrot.slane %v1171_v23, 2 }
 0x648   :  { %1208 = vmatmul.mubr.bf16.vlgmr.msra.gmra.mxu0 %v1173_v5  ;;  %1873 = vmatmul.mubr.bf16.vlgmr.msra.gmra.mxu1 %v1173_v5 }
 0x649   :  { %1294 = vmatpush1.bf16.msra.mxu0 %v2073_v7  ;;  %1877 = vmatpush3.bf16.msra.mxu1 %v2074_v8 }
 0x64a   :  { %1295 = vmatprep.subr.bf16.mxu0 %v2075_v11  ;;  %1878 = vmatprep.subr.bf16.mxu1 %v2118_v2 }
 0x64b   :  { %1325 = vmatprep.mubr.bf16.mxu0 %v2119_v3  ;;  %1892 = vmatprep.mubr.msk.bf16.mxu1 %vm2120_vm0, %v2118_v2  ;;  %v2079_v3 = vld [vmem:[%s2889_s3 + $0x78] ss:$12 sps:$4 sm:$0xff]  }
 0x64d   :  { %1296 = vmatpush1.bf16.msra.mxu0 %v2076_v63  ;;  %1879 = vmatpush3.bf16.msra.mxu1 %v2077_v1  ;;  %v1985_v63 = vld [vmem:[%s2892_s6 + $0x30] sm:$0xff]   ;;  %v1987_v1 = vld [vmem:[%s2892_s6 + $0x20] sm:$0xff]  }
 0x64e   :  { %1297 = vmatprep.subr.bf16.mxu0 %v2078_v58  ;;  %1880 = vmatprep.subr.bf16.mxu1 %v2118_v2  ;;  %v1988_v58 = vld [vmem:[%s2892_s6 + $0x18] sm:$0xff]  }
 0x651   :  { %1298 = vmatpush1.bf16.msra.mxu0 %v2079_v3  ;;  %1881 = vmatpush3.bf16.msra.mxu1 %v2080_v12  ;;  %v1989_v3 = vld [vmem:[%s2892_s6 + $0x10] sm:$0xff]   ;;  %v1990_v12 = vld [vmem:[%s2892_s6 + $0x8] sm:$0xff]  }
 0x652   :  { %1299 = vmatprep.subr.bf16.mxu0 %v2081_v13  ;;  %1882 = vmatprep.subr.bf16.mxu1 %v2118_v2  ;;  %v1991_v13 = vld [vmem:[%s2892_s6] sm:$0xff]  }
 0x655   :  { %1300 = vmatpush1.bf16.msra.mxu0 %v2082_v14  ;;  %1883 = vmatpush3.bf16.msra.mxu1 %v2083_v16 }
 0x656   :  { %1301 = vmatprep.subr.bf16.mxu0 %v2084_v18  ;;  %1884 = vmatprep.subr.bf16.mxu1 %v2118_v2 }
 0x659   :  { %1302 = vmatpush1.bf16.msra.mxu0 %v2085_v4  ;;  %1885 = vmatpush3.bf16.msra.mxu1 %v2086_v49 }
 0x65a   :  { %1303 = vmatprep.subr.bf16.mxu0 %v2087_v22  ;;  %1886 = vmatprep.subr.bf16.mxu1 %v2118_v2 }
 0x65d   :  { %1304 = vmatpush1.bf16.msra.mxu0 %v2088_v24  ;;  %1887 = vmatpush3.bf16.msra.mxu1 %v2089_v15 }
 0x65e   :  { %1305 = vmatprep.subr.bf16.mxu0 %v2090_v17  ;;  %1888 = vmatprep.subr.bf16.mxu1 %v2118_v2 }
 0x661   :  { %1306 = vmatpush1.bf16.msra.mxu0 %v2091_v25  ;;  %1889 = vmatpush3.bf16.msra.mxu1 %v2092_v26 }
 0x662   :  { %1307 = vmatprep.subr.bf16.mxu0 %v2093_v27  ;;  %1890 = vmatprep.subr.bf16.mxu1 %v2118_v2 }
 0x665   :  { %1308 = vmatpush1.bf16.msra.mxu0 %v2094_v28  ;;  %1891 = vmatpush3.bf16.msra.mxu1 %v2095_v30 }
 0x666   :  { %1896 = vmatprep.subr.bf16.mxu0 %v2118_v2 }
 0x708   :  { %v1209_v31 = vpop.f32.mrf.mxu0  ;;  %v1250_v33 = vpop.f32.mrf.mxu1 }
 0x709   :  { %v1210_v34 = vadd.f32 %v1209_v31, %v2469_v6  ;;  %v1251_v53 = vadd.f32 %v1250_v33, %v2481_v54 }
 0x70a   :  { %v1211_v35 = vpop.f32.mrf.mxu0  ;;  %v1874_v36 = vpop.f32.mrf.mxu1 }
 0x70b   :  { %v1257_v37 = vrot.slane %v1210_v34, 2  ;;  %v1212_v38 = vadd.f32 %v1211_v35, %v2473_v10  ;;  %v1277_v21 = vrot.slane %v1251_v53, 2 }
 0x70c   :  { %v1213_v39 = vpop.f32.mrf.mxu0  ;;  %v1253_v40 = vpop.f32.mrf.mxu1 }
 0x70d   :  { %v1259_v41 = vadd.f32 %v1257_v37, %v2471_v9  ;;  %v1267_v45 = vrot.slane %v1212_v38, 2 }
 0x70e   :  { %v1214_v42 = vpop.f32.mrf.mxu0  ;;  %v1875_v43 = vpop.f32.mrf.mxu1 }
 0x70f   :  { %v1613_v44 = vmul.f32 -1.442695, %v1259_v41  ;;  %v1269_v46 = vadd.f32 %v1267_v45, %v2478_v19 }
 0x711   :  { %2052 = vpow2.f32 %v1613_v44  ;;  %v1614_v47 = vmul.f32 -1.442695, %v1269_v46 }
 0x713   :  { %2054 = vpow2.f32 %v1614_v47 }
 0x71e   :  { %v2053_v48 = vpop.eup %2052 }
 0x71f   :  { %v1263_v50 = vadd.f32 1.0, %v2053_v48 }
 0x720   :  { %v2055_v52 = vpop.eup %2054 }
 0x721   :  { %2056 = vrcp.f32 %v1263_v50  ;;  %v1273_v20 = vadd.f32 1.0, %v2055_v52 }
 0x723   :  { %2058 = vrcp.f32 %v1273_v20 }
 0x72e   :  { %v2057_v29 = vpop.eup %2056 }
 0x72f   :  { %v1279_v32 = vmul.f32 %v2057_v29, %v1277_v21 }
 0x730   :  { %v2059_v56 = vpop.eup %2058 }
 0x731   :  { %v1280_v51 = vadd.f32 %v1279_v32, %v2484_v61  ;;  %v1282_v57 = vsub.f32 1.0, %v2059_v56  ;;  %v1287_v23 = vmul.f32 %v2059_v56, %v1285_v59 }
 0x733   :  { %2060 = vtanh.f32 %v1280_v51 }
 0x740   :  { %v2061_v55 = vpop.eup %2060 }
 0x741   :  { %v1283_v62 = vmul.f32 %v2061_v55, %v1282_v57 }
 0x743   :  { %v2828_v5 = vadd.f32 %v1287_v23, %v1283_v62 }
 0x745   :  { %v1289_v7 = vpack.c.bf16 %v2828_v5, %v2828_v5  ;;  %v2834_v8 = vsel %vm1418_vm6, %v2739_v0, %v2828_v5  ;;  %v1986_v0 = vld [vmem:[%s2892_s6 + $0x28] sm:$0xff]  }
 0x747   :  { %v1291_v11 = vrot.slane %v1289_v7, 3 }
 0x749   :  { %1326 = vmatmul.mubr.bf16.vlgmr.msra.gmra.mxu0 %v1291_v11  ;;  %1893 = vmatmul.mubr.bf16.vlgmr.msra.gmra.mxu1 %v1291_v11 }
 0x74a   :  { %1912 = vmatprep.mubr.msk.bf16.mxu0 %vm2120_vm0, %v2118_v2  ;;  %1897 = vmatpush3.bf16.msra.mxu0 %v1984_v60 }
 0x74b   :  { %1898 = vmatprep.subr.bf16.mxu0 %v2118_v2 }
 0x74e   :  { %1899 = vmatpush3.bf16.msra.mxu0 %v1985_v63 }
 0x74f   :  { %1900 = vmatprep.subr.bf16.mxu0 %v2118_v2 }
 0x752   :  { %1901 = vmatpush3.bf16.msra.mxu0 %v1986_v0 }
 0x753   :  { %1902 = vmatprep.subr.bf16.mxu0 %v2118_v2 }
 0x756   :  { %1903 = vmatpush3.bf16.msra.mxu0 %v1987_v1 }
 0x757   :  { %1904 = vmatprep.subr.bf16.mxu0 %v2118_v2 }
 0x75a   :  { %1905 = vmatpush3.bf16.msra.mxu0 %v1988_v58 }
 0x75b   :  { %1906 = vmatprep.subr.bf16.mxu0 %v2118_v2 }
 0x75e   :  { %1907 = vmatpush3.bf16.msra.mxu0 %v1989_v3 }
 0x75f   :  { %1908 = vmatprep.subr.bf16.mxu0 %v2118_v2 }
 0x762   :  { %1909 = vmatpush3.bf16.msra.mxu0 %v1990_v12 }
 0x763   :  { %1910 = vmatprep.subr.bf16.mxu0 %v2118_v2 }
 0x766   :  { %1911 = vmatpush3.bf16.msra.mxu0 %v1991_v13 }
 0x809   :  { %v1327_v14 = vpop.f32.mrf.mxu0  ;;  %v1368_v16 = vpop.f32.mrf.mxu1 }
 0x80a   :  { %v1328_v18 = vadd.f32 %v1327_v14, %v2469_v6  ;;  %v1369_v35 = vadd.f32 %v1368_v16, %v2481_v54 }
 0x80b   :  { %v1329_v4 = vpop.f32.mrf.mxu0  ;;  %v1894_v49 = vpop.f32.mrf.mxu1 }
 0x80c   :  { %v1375_v22 = vrot.slane %v1328_v18, 1  ;;  %v1330_v24 = vadd.f32 %v1329_v4, %v2473_v10  ;;  %v1395_v36 = vrot.slane %v1369_v35, 1 }
 0x80d   :  { %v1331_v15 = vpop.f32.mrf.mxu0  ;;  %v1371_v17 = vpop.f32.mrf.mxu1 }
 0x80e   :  { %v1377_v25 = vadd.f32 %v1375_v22, %v2471_v9  ;;  %v1385_v30 = vrot.slane %v1330_v24, 1 }
 0x80f   :  { %v1332_v26 = vpop.f32.mrf.mxu0  ;;  %v1895_v27 = vpop.f32.mrf.mxu1 }
 0x810   :  { %v1615_v28 = vmul.f32 -1.442695, %v1377_v25  ;;  %v1387_v2 = vadd.f32 %v1385_v30, %v2478_v19  ;;  %v1403_v19 = vrot.slane %v2828_v5, 7 }
 0x812   :  { %2062 = vpow2.f32 %v1615_v28  ;;  %v1616_v31 = vmul.f32 -1.442695, %v1387_v2 }
 0x814   :  { %2064 = vpow2.f32 %v1616_v31 }
 0x81f   :  { %v2063_v33 = vpop.eup %2062 }
 0x820   :  { %v1381_v6 = vadd.f32 1.0, %v2063_v33 }
 0x821   :  { %v2065_v34 = vpop.eup %2064 }
 0x822   :  { %2066 = vrcp.f32 %v1381_v6  ;;  %v1391_v10 = vadd.f32 1.0, %v2065_v34 }
 0x824   :  { %2068 = vrcp.f32 %v1391_v10 }
 0x82f   :  { %v2067_v37 = vpop.eup %2066 }
 0x830   :  { %v1397_v38 = vmul.f32 %v2067_v37, %v1395_v36 }
 0x831   :  { %v2069_v39 = vpop.eup %2068 }
 0x832   :  { %v1398_v9 = vadd.f32 %v1397_v38, %v2484_v61  ;;  %v1400_v40 = vsub.f32 1.0, %v2069_v39  ;;  %v1405_v43 = vmul.f32 %v2069_v39, %v1403_v19  ;;  %v1617_v61 = vld [vmem:[%s2893_s7] ss:$0 sm:$0xff] }
 0x834   :  { %2070 = vtanh.f32 %v1398_v9 }
 0x841   :  { %v2071_v41 = vpop.eup %2070 }
 0x842   :  { %v1401_v42 = vmul.f32 %v2071_v41, %v1400_v40 }
 0x844   :  { %v1406_v44 = vadd.f32 %v1405_v43, %v1401_v42 }
 0x846   :  { %1407 = vst [vmem:[%s2895_s9 - $0x7] sm:$0x80] %v1406_v44  ;;  %v1421_v54 = vsel %vm1420_vm7, %v2834_v8, %v1406_v44 }
 0x847   :  { %v1422_v45 = vpack.c.bf16 %v1421_v54, %v1421_v54 }
 0x849   :  { %1913 = vmatmul.mubr.bf16.vlgmr.msra.gmra.mxu0 %v1422_v45 }
 0x909   :  { %v1528_v46 = vpop.f32.mrf.mxu0 }
 0x90a   :  { %v1529_v47 = vadd.f32 %v1617_v61, %v1528_v46 }
 0x90b   :  { %v1914_v48 = vpop.f32.mrf.mxu0 }
 0x90c   :  { %1534 = vst [vmem:[#allocation2] sm:$0xff] %v1529_v47 }
 0x90d   :  { %v1531_v50 = vpop.f32.mrf.mxu0 }
 0x90e   :  { %2107 = shalt.err (!%p2104_p4)
}
 0x90f   :  { %1544 = dma.vmem_to_hbm [thread:$0]  %s1542_s16, 128, %s2894_s8, [#allocation3]   ;;  %v1915_v52 = vpop.f32.mrf.mxu0 }
 0x910   :  { %2116 = dma.done.wait [#allocation3], 128  }
 0x911   :  { %2117 = vsyncadd [#allocation3], 4294967168 }
 0x912   :  { %1552 = vsyncpa [#allocation3], 1 }

</bundles_post_ra>
